<compile_context>
chip_gen: v5e
topology: v5e:2x2
jax: 0.10.0
libtpu: 0.0.40
codegen_flags: <defaults>
</compile_context>

<pallas_src>
import numpy as np
import jax
import jax.numpy as jnp
from jax import lax
from jax.experimental import pallas as pl
from jax.experimental.pallas import tpu as pltpu


# ----------------------------- parameter setup (init-time glue) ---------------

def _spectral_normalize(w):
    # PyTorch's spectral_norm divides the weight by its largest singular value
    # (power iteration); we use the exact sigma once at init since the weights
    # are synthetic and fixed.
    mat = np.reshape(w, (w.shape[0], -1))
    sigma = np.linalg.svd(mat, compute_uv=False)[0]
    return (w / sigma).astype(np.float32)


def _round_up(v, m):
    return (v + m - 1) // m * m


def pack_params(w_skip_pt, b_skip, w1_pt, b1, w2_pt, b2):
    """Pack PyTorch-layout conv weights for the kernel:
       * conv1 (3x3) and the 1x1 skip conv are folded into ONE weight:
           rows [0:cpad_mid)             -> conv1 taps (tap-major, K = 9*cpad_in)
           rows [cpad_mid:cpad_mid+Cout) -> w_skip, centre-tap K-block only
       * conv2 (3x3) -> (cpad_out, 9*cpad_mid), tap-major
       * biases -> (rows, 1) f32 for lane broadcast
       Matmul operands are stored in bfloat16 (MXU-native)."""
    Cout, Cin = w1_pt.shape[0], w1_pt.shape[1]
    cpad_in = _round_up(Cin, 8)
    cpad_mid = _round_up(Cout, 8)
    cpad_out = _round_up(Cout, 8)

    w1c = np.zeros((cpad_mid + cpad_out, 9 * cpad_in), np.float32)
    w2c = np.zeros((cpad_out, 9 * cpad_mid), np.float32)
    for ky in range(3):
        for kx in range(3):
            k = ky * 3 + kx
            w1c[:Cout, k * cpad_in:k * cpad_in + Cin] = w1_pt[:, :, ky, kx]
            w2c[:Cout, k * cpad_mid:k * cpad_mid + Cout] = w2_pt[:, :, ky, kx]
    # 1x1 skip conv == centre tap (k = 4) of the im2col, which is exactly x.
    w1c[cpad_mid:cpad_mid + Cout, 4 * cpad_in:4 * cpad_in + Cin] = w_skip_pt[:, :, 0, 0]

    b1c = np.zeros((cpad_mid + cpad_out, 1), np.float32)
    b1c[:Cout, 0] = b1
    b1c[cpad_mid:cpad_mid + Cout, 0] = b_skip
    b2c = np.zeros((cpad_out, 1), np.float32)
    b2c[:Cout, 0] = b2

    return {
        "w1c": jnp.asarray(w1c, jnp.bfloat16),
        "b1c": jnp.asarray(b1c),
        "w2c": jnp.asarray(w2c, jnp.bfloat16),
        "b2c": jnp.asarray(b2c),
        "cin": Cin, "cout": Cout,
        "cpad_in": cpad_in, "cpad_mid": cpad_mid, "cpad_out": cpad_out,
    }


# ----------------------------- Pallas kernel + wrapper ------------------------

def res_block_down(x_nchw, params, H, W):
    N, Cin = int(x_nchw.shape[0]), int(x_nchw.shape[1])
    Cout = params["cout"]
    cpad_in = params["cpad_in"]
    cpad_mid = params["cpad_mid"]
    cpad_out = params["cpad_out"]
    assert Cin == params["cin"]
    assert H % 2 == 0 and W % 2 == 0
    assert (H & (H - 1)) == 0 and (W & (W - 1)) == 0, "H, W must be powers of two"

    HW = H * W
    Hq, Wq = H // 2, W // 2
    HWq = Hq * Wq
    L = N * HW
    PAD = 128                       # lane padding for the 3x3 tap windows
    Lp = L + 2 * PAD
    assert PAD >= W + 1
    lw, lwq = int(np.log2(W)), int(np.log2(Wq))
    offs = [dy * W + dx for dy in (-1, 0, 1) for dx in (-1, 0, 1)]

    # (N, Cin, H, W) -> (Cin, N*H*W): channels in sublanes, batch*spatial fused
    # into the lane axis.  Pad channels to a multiple of 8 and lanes by PAD.
    x_cl = jnp.transpose(x_nchw, (1, 0, 2, 3)).reshape(Cin, L)
    x_cl = jnp.pad(x_cl, ((0, cpad_in - Cin), (PAD, PAD)))

    def kernel(x_ref, w1c_ref, b1c_ref, w2c_ref, b2c_ref, out_ref, hpad_ref):
        # ---- tap-validity masks, generated in-kernel (no HBM mask input) ----
        lane = lax.broadcasted_iota(jnp.int32, (1, L), 1)
        r = (lane >> lw) & (H - 1)          # in-image row of each output pixel
        c = lane & (W - 1)                  # in-image col
        row_ok = {-1: (r >= 1).astype(jnp.float32), 0: None,
                  1: (r <= H - 2).astype(jnp.float32)}
        col_ok = {-1: (c >= 1).astype(jnp.float32), 0: None,
                  1: (c <= W - 2).astype(jnp.float32)}
        masks = []
        for dy in (-1, 0, 1):
            for dx in (-1, 0, 1):
                rm, cm = row_ok[dy], col_ok[dx]
                m = rm if cm is None else (cm if rm is None else rm * cm)
                masks.append(m)

        def im2col(src_ref):
            # 9 lane-shifted, edge-masked windows stacked along the contraction
            # dim -> each 3x3 conv collapses to ONE MXU matmul (bf16 operands).
            taps = []
            for k, off in enumerate(offs):
                t = src_ref[:, PAD + off:PAD + off + L]
                if masks[k] is not None:
                    t = t * masks[k]                    # f32 VPU masking
                taps.append(t)
            return jnp.concatenate(taps, axis=0).astype(jnp.bfloat16)

        # conv1 (3x3) with the 1x1 skip conv folded in as extra output rows.
        hs = jnp.dot(w1c_ref[...], im2col(x_ref),
                     preferred_element_type=jnp.float32) + b1c_ref[...]
        h = jnp.maximum(hs[:cpad_mid, :], 0.0)          # ReLU (main path only)
        skip = hs[cpad_mid:cpad_mid + cpad_out, :]

        # Stage h into a lane-padded scratch; zero ONLY the two edge strips.
        hpad_ref[:, :PAD] = jnp.zeros((cpad_mid, PAD), jnp.float32)
        hpad_ref[:, PAD + L:] = jnp.zeros((cpad_mid, PAD), jnp.float32)
        hpad_ref[:, PAD:PAD + L] = h

        # conv2 (3x3, stride 1, pad 1): ONE matmul over the folded 9*Cmid dim.
        main = jnp.dot(w2c_ref[...], im2col(hpad_ref),
                       preferred_element_type=jnp.float32) + b2c_ref[...]

        # avg_pool2d is linear: pool(main) + pool(skip) == pool(main + skip).
        summed = main + skip

        # 2x2 average pool: per-image (HW, HW/4) 0.25-matrix built from iota
        # (no O((N*H*W)^2) matrix, no HBM traffic).
        p = lax.broadcasted_iota(jnp.int32, (HW, HWq), 0)
        q = lax.broadcasted_iota(jnp.int32, (HW, HWq), 1)
        pr, pc = (p >> lw) & (H - 1), p & (W - 1)
        qr, qc = q >> lwq, q & (Wq - 1)
        poolm = (((pr >> 1) == qr) & ((pc >> 1) == qc)).astype(jnp.float32) * 0.25

        for n in range(N):              # small N; lane slices are 128-aligned
            pooled = jnp.dot(summed[:, n * HW:(n + 1) * HW], poolm,
                             preferred_element_type=jnp.float32)
            out_ref[:, n * HWq:(n + 1) * HWq] = jnp.maximum(pooled, 0.0)

    out = pl.pallas_call(
        kernel,
        out_shape=jax.ShapeDtypeStruct((cpad_out, N * HWq), jnp.float32),
        grid_spec=pltpu.PrefetchScalarGridSpec(
            num_scalar_prefetch=0,
            grid=(1,),                  # whole batch fused into one step
            in_specs=[
                pl.BlockSpec((cpad_in, Lp), lambda i: (0, 0)),                 # x (lane-padded)
                pl.BlockSpec((cpad_mid + cpad_out, 9 * cpad_in), lambda i: (0, 0)),  # w1+skip
                pl.BlockSpec((cpad_mid + cpad_out, 1), lambda i: (0, 0)),      # b1+b_skip
                pl.BlockSpec((cpad_out, 9 * cpad_mid), lambda i: (0, 0)),      # w2
                pl.BlockSpec((cpad_out, 1), lambda i: (0, 0)),                 # b2
            ],
            out_specs=pl.BlockSpec((cpad_out, N * HWq), lambda i: (0, 0)),
            scratch_shapes=[pltpu.VMEM((cpad_mid, Lp), jnp.float32)],          # padded h
        ),
        compiler_params=pltpu.CompilerParams(
            dimension_semantics=("arbitrary",)),
    )(x_cl, params["w1c"], params["b1c"], params["w2c"], params["b2c"])

    # (cpad_out, N*Hq*Wq) -> (N, Cout, Hq, Wq): wrapper-side layout plumbing.
    return out[:Cout].reshape(Cout, N, Hq, Wq).transpose(1, 0, 2, 3)


# ----------------------------- pure-JAX reference (for checking) --------------

def _avg_pool2(x):
    N, C, H, W = x.shape
    return x.reshape(N, C, H // 2, 2, W // 2, 2).mean(axis=(3, 5))


def reference(x, w_skip_pt, b_skip, w1_pt, b1, w2_pt, b2):
    dn = ('NCHW', 'OIHW', 'NCHW')
    skip = lax.conv_general_dilated(
        x, w_skip_pt, (1, 1), 'VALID', dimension_numbers=dn) + b_skip[None, :, None, None]
    skip = _avg_pool2(skip)
    main = lax.conv_general_dilated(
        x, w1_pt, (1, 1), ((1, 1), (1, 1)), dimension_numbers=dn) + b1[None, :, None, None]
    main = jnp.maximum(main, 0.0)
    main = lax.conv_general_dilated(
        main, w2_pt, (1, 1), ((1, 1), (1, 1)), dimension_numbers=dn) + b2[None, :, None, None]
    main = _avg_pool2(main)
    return jnp.maximum(main + skip, 0.0)


# ----------------------------- main --------------------------------------------

if __name__ == "__main__":
    N, Cin, Cout, H, W = 2, 4, 8, 16, 16

    # deterministic synthetic parameters (PyTorch shapes), spectral-normalized
    rng = np.random.RandomState(0)
    w_skip_pt = _spectral_normalize(rng.randn(Cout, Cin, 1, 1).astype(np.float32) * 0.2)
    w1_pt = _spectral_normalize(rng.randn(Cout, Cin, 3, 3).astype(np.float32) * 0.2)
    w2_pt = _spectral_normalize(rng.randn(Cout, Cout, 3, 3).astype(np.float32) * 0.2)
    b_skip = (rng.randn(Cout) * 0.1).astype(np.float32)
    b1 = (rng.randn(Cout) * 0.1).astype(np.float32)
    b2 = (rng.randn(Cout) * 0.1).astype(np.float32)

    params = pack_params(w_skip_pt, b_skip, w1_pt, b1, w2_pt, b2)

    # deterministic input, NCHW like PyTorch
    x = jax.random.normal(jax.random.PRNGKey(0), (N, Cin, H, W), jnp.float32)

    out = res_block_down(x, params, H, W)
    out = jax.block_until_ready(out)

    ref = reference(x, jnp.asarray(w_skip_pt), jnp.asarray(b_skip),
                    jnp.asarray(w1_pt), jnp.asarray(b1),
                    jnp.asarray(w2_pt), jnp.asarray(b2))
    # bf16 matmul operands (weights + im2col) vs an f32 reference -> loosen the
    # tolerance to the standard bf16 level; structure/math is otherwise exact.
    np.testing.assert_allclose(np.asarray(out), np.asarray(ref), rtol=2e-2, atol=2e-2)

    print("KERNEL_OK")
</pallas_src>

<mosaic_0001>
module attributes {stable_mosaic.version = 11 : i64} {
  func.func @kernel(%arg0: i32, %arg1: memref<8x768xf32, #tpu.memory_space<vmem>>, %arg2: memref<16x72xbf16, #tpu.memory_space<vmem>>, %arg3: memref<16x1xf32, #tpu.memory_space<vmem>>, %arg4: memref<8x72xbf16, #tpu.memory_space<vmem>>, %arg5: memref<8x1xf32, #tpu.memory_space<vmem>>, %arg6: memref<8x128xf32, #tpu.memory_space<vmem>>, %arg7: memref<8x768xf32, #tpu.memory_space<vmem>>) attributes {dimension_semantics = [#tpu.dimension_semantics<arbitrary>], iteration_bounds = array<i64: 1>, scalar_prefetch = 0 : i64, scratch_operands = 1 : i64, tpu.core_type = #tpu.core_type<tc>, window_params = [{pipeline_mode = #tpu.pipeline_mode<synchronous>, transform_indices = @transform_0, window_bounds = array<i64: 8, 768>}, {pipeline_mode = #tpu.pipeline_mode<synchronous>, transform_indices = @transform_1, window_bounds = array<i64: 16, 72>}, {pipeline_mode = #tpu.pipeline_mode<synchronous>, transform_indices = @transform_2, window_bounds = array<i64: 16, 1>}, {pipeline_mode = #tpu.pipeline_mode<synchronous>, transform_indices = @transform_3, window_bounds = array<i64: 8, 72>}, {pipeline_mode = #tpu.pipeline_mode<synchronous>, transform_indices = @transform_4, window_bounds = array<i64: 8, 1>}, {pipeline_mode = #tpu.pipeline_mode<synchronous>, transform_indices = @transform_5, window_bounds = array<i64: 8, 128>}]} {
    %0 = tpu.iota {dimensions = array<i32: 1>} : vector<1x512xi32>
    %c4_i32 = arith.constant 4 : i32
    %1 = vector.broadcast %c4_i32 : i32 to vector<1x512xi32>
    %2 = arith.shrsi %0, %1 : vector<1x512xi32>
    %c15_i32 = arith.constant 15 : i32
    %3 = vector.broadcast %c15_i32 : i32 to vector<1x512xi32>
    %4 = arith.andi %2, %3 : vector<1x512xi32>
    %c15_i32_0 = arith.constant 15 : i32
    %5 = vector.broadcast %c15_i32_0 : i32 to vector<1x512xi32>
    %6 = arith.andi %0, %5 : vector<1x512xi32>
    %c1_i32 = arith.constant 1 : i32
    %7 = vector.broadcast %c1_i32 : i32 to vector<1x512xi32>
    %8 = arith.cmpi sge, %4, %7 : vector<1x512xi32>
    %9 = arith.extui %8 : vector<1x512xi1> to vector<1x512xi32>
    %10 = arith.sitofp %9 : vector<1x512xi32> to vector<1x512xf32>
    %c14_i32 = arith.constant 14 : i32
    %11 = vector.broadcast %c14_i32 : i32 to vector<1x512xi32>
    %12 = arith.cmpi sle, %4, %11 : vector<1x512xi32>
    %13 = arith.extui %12 : vector<1x512xi1> to vector<1x512xi32>
    %14 = arith.sitofp %13 : vector<1x512xi32> to vector<1x512xf32>
    %c1_i32_1 = arith.constant 1 : i32
    %15 = vector.broadcast %c1_i32_1 : i32 to vector<1x512xi32>
    %16 = arith.cmpi sge, %6, %15 : vector<1x512xi32>
    %17 = arith.extui %16 : vector<1x512xi1> to vector<1x512xi32>
    %18 = arith.sitofp %17 : vector<1x512xi32> to vector<1x512xf32>
    %c14_i32_2 = arith.constant 14 : i32
    %19 = vector.broadcast %c14_i32_2 : i32 to vector<1x512xi32>
    %20 = arith.cmpi sle, %6, %19 : vector<1x512xi32>
    %21 = arith.extui %20 : vector<1x512xi1> to vector<1x512xi32>
    %22 = arith.sitofp %21 : vector<1x512xi32> to vector<1x512xf32>
    %23 = arith.mulf %10, %18 : vector<1x512xf32>
    %24 = arith.mulf %10, %22 : vector<1x512xf32>
    %25 = arith.mulf %14, %18 : vector<1x512xf32>
    %26 = arith.mulf %14, %22 : vector<1x512xf32>
    %c0 = arith.constant 0 : index
    %c0_3 = arith.constant 0 : index
    %27 = vector.load %arg2[%c0, %c0_3] : memref<16x72xbf16, #tpu.memory_space<vmem>>, vector<16x72xbf16>
    %c0_4 = arith.constant 0 : index
    %c111 = arith.constant 111 : index
    %28 = vector.load %arg1[%c0_4, %c111] : memref<8x768xf32, #tpu.memory_space<vmem>>, vector<8x512xf32>
    %29 = vector.broadcast %23 : vector<1x512xf32> to vector<8x512xf32>
    %30 = arith.mulf %28, %29 : vector<8x512xf32>
    %c0_5 = arith.constant 0 : index
    %c112 = arith.constant 112 : index
    %31 = vector.load %arg1[%c0_5, %c112] : memref<8x768xf32, #tpu.memory_space<vmem>>, vector<8x512xf32>
    %32 = vector.broadcast %10 : vector<1x512xf32> to vector<8x512xf32>
    %33 = arith.mulf %31, %32 : vector<8x512xf32>
    %c0_6 = arith.constant 0 : index
    %c113 = arith.constant 113 : index
    %34 = vector.load %arg1[%c0_6, %c113] : memref<8x768xf32, #tpu.memory_space<vmem>>, vector<8x512xf32>
    %35 = vector.broadcast %24 : vector<1x512xf32> to vector<8x512xf32>
    %36 = arith.mulf %34, %35 : vector<8x512xf32>
    %c0_7 = arith.constant 0 : index
    %c127 = arith.constant 127 : index
    %37 = vector.load %arg1[%c0_7, %c127] : memref<8x768xf32, #tpu.memory_space<vmem>>, vector<8x512xf32>
    %38 = vector.broadcast %18 : vector<1x512xf32> to vector<8x512xf32>
    %39 = arith.mulf %37, %38 : vector<8x512xf32>
    %c0_8 = arith.constant 0 : index
    %c128 = arith.constant 128 : index
    %40 = vector.load %arg1[%c0_8, %c128] : memref<8x768xf32, #tpu.memory_space<vmem>>, vector<8x512xf32>
    %c0_9 = arith.constant 0 : index
    %c129 = arith.constant 129 : index
    %41 = vector.load %arg1[%c0_9, %c129] : memref<8x768xf32, #tpu.memory_space<vmem>>, vector<8x512xf32>
    %42 = vector.broadcast %22 : vector<1x512xf32> to vector<8x512xf32>
    %43 = arith.mulf %41, %42 : vector<8x512xf32>
    %c0_10 = arith.constant 0 : index
    %c143 = arith.constant 143 : index
    %44 = vector.load %arg1[%c0_10, %c143] : memref<8x768xf32, #tpu.memory_space<vmem>>, vector<8x512xf32>
    %45 = vector.broadcast %25 : vector<1x512xf32> to vector<8x512xf32>
    %46 = arith.mulf %44, %45 : vector<8x512xf32>
    %c0_11 = arith.constant 0 : index
    %c144 = arith.constant 144 : index
    %47 = vector.load %arg1[%c0_11, %c144] : memref<8x768xf32, #tpu.memory_space<vmem>>, vector<8x512xf32>
    %48 = vector.broadcast %14 : vector<1x512xf32> to vector<8x512xf32>
    %49 = arith.mulf %47, %48 : vector<8x512xf32>
    %c0_12 = arith.constant 0 : index
    %c145 = arith.constant 145 : index
    %50 = vector.load %arg1[%c0_12, %c145] : memref<8x768xf32, #tpu.memory_space<vmem>>, vector<8x512xf32>
    %51 = vector.broadcast %26 : vector<1x512xf32> to vector<8x512xf32>
    %52 = arith.mulf %50, %51 : vector<8x512xf32>
    %53 = tpu.concatenate %30, %33, %36, %39, %40, %43, %46, %49, %52 in 0 : vector<8x512xf32>, vector<8x512xf32>, vector<8x512xf32>, vector<8x512xf32>, vector<8x512xf32>, vector<8x512xf32>, vector<8x512xf32>, vector<8x512xf32>, vector<8x512xf32> -> vector<72x512xf32>
    %54 = arith.truncf %53 : vector<72x512xf32> to vector<72x512xbf16>
    %cst = arith.constant dense<0.000000e+00> : vector<16x512xf32>
    %55 = tpu.matmul %27, %54, %cst {dimension_numbers = #tpu.dot_dimension_numbers<[1], [0], [0], [1], [0, 0, 1, 1], [], []>} : vector<16x72xbf16>, vector<72x512xbf16>, vector<16x512xf32> -> vector<16x512xf32>
    %c0_13 = arith.constant 0 : index
    %c0_14 = arith.constant 0 : index
    %56 = vector.load %arg3[%c0_13, %c0_14] : memref<16x1xf32, #tpu.memory_space<vmem>>, vector<16x1xf32>
    %57 = vector.broadcast %56 : vector<16x1xf32> to vector<16x512xf32>
    %58 = arith.addf %55, %57 : vector<16x512xf32>
    %59 = vector.extract_strided_slice %58 {offsets = [0, 0], sizes = [8, 512], strides = [1, 1]} : vector<16x512xf32> to vector<8x512xf32>
    %cst_15 = arith.constant 0.000000e+00 : f32
    %60 = vector.broadcast %cst_15 : f32 to vector<8x512xf32>
    %61 = arith.maximumf %59, %60 : vector<8x512xf32>
    %62 = vector.extract_strided_slice %58 {offsets = [8, 0], sizes = [8, 512], strides = [1, 1]} : vector<16x512xf32> to vector<8x512xf32>
    %cst_16 = arith.constant 0.000000e+00 : f32
    %63 = vector.broadcast %cst_16 : f32 to vector<8x128xf32>
    %c0_17 = arith.constant 0 : index
    %c0_18 = arith.constant 0 : index
    %64 = vector.load %arg7[%c0_17, %c0_18] : memref<8x768xf32, #tpu.memory_space<vmem>>, vector<8x128xf32>
    tpu.vector_store %arg7[%c0_17, %c0_18], %63 {strides = array<i32>} : memref<8x768xf32, #tpu.memory_space<vmem>>, vector<8x128xf32>,
    %cst_19 = arith.constant 0.000000e+00 : f32
    %65 = vector.broadcast %cst_19 : f32 to vector<8x128xf32>
    %c0_20 = arith.constant 0 : index
    %c640 = arith.constant 640 : index
    %66 = vector.load %arg7[%c0_20, %c640] : memref<8x768xf32, #tpu.memory_space<vmem>>, vector<8x128xf32>
    tpu.vector_store %arg7[%c0_20, %c640], %65 {strides = array<i32>} : memref<8x768xf32, #tpu.memory_space<vmem>>, vector<8x128xf32>,
    %c0_21 = arith.constant 0 : index
    %c128_22 = arith.constant 128 : index
    %67 = vector.load %arg7[%c0_21, %c128_22] : memref<8x768xf32, #tpu.memory_space<vmem>>, vector<8x512xf32>
    tpu.vector_store %arg7[%c0_21, %c128_22], %61 {strides = array<i32>} : memref<8x768xf32, #tpu.memory_space<vmem>>, vector<8x512xf32>,
    %c0_23 = arith.constant 0 : index
    %c0_24 = arith.constant 0 : index
    %68 = vector.load %arg4[%c0_23, %c0_24] : memref<8x72xbf16, #tpu.memory_space<vmem>>, vector<8x72xbf16>
    %c0_25 = arith.constant 0 : index
    %c111_26 = arith.constant 111 : index
    %69 = vector.load %arg7[%c0_25, %c111_26] : memref<8x768xf32, #tpu.memory_space<vmem>>, vector<8x512xf32>
    %70 = vector.broadcast %23 : vector<1x512xf32> to vector<8x512xf32>
    %71 = arith.mulf %69, %70 : vector<8x512xf32>
    %c0_27 = arith.constant 0 : index
    %c112_28 = arith.constant 112 : index
    %72 = vector.load %arg7[%c0_27, %c112_28] : memref<8x768xf32, #tpu.memory_space<vmem>>, vector<8x512xf32>
    %73 = vector.broadcast %10 : vector<1x512xf32> to vector<8x512xf32>
    %74 = arith.mulf %72, %73 : vector<8x512xf32>
    %c0_29 = arith.constant 0 : index
    %c113_30 = arith.constant 113 : index
    %75 = vector.load %arg7[%c0_29, %c113_30] : memref<8x768xf32, #tpu.memory_space<vmem>>, vector<8x512xf32>
    %76 = vector.broadcast %24 : vector<1x512xf32> to vector<8x512xf32>
    %77 = arith.mulf %75, %76 : vector<8x512xf32>
    %c0_31 = arith.constant 0 : index
    %c127_32 = arith.constant 127 : index
    %78 = vector.load %arg7[%c0_31, %c127_32] : memref<8x768xf32, #tpu.memory_space<vmem>>, vector<8x512xf32>
    %79 = vector.broadcast %18 : vector<1x512xf32> to vector<8x512xf32>
    %80 = arith.mulf %78, %79 : vector<8x512xf32>
    %c0_33 = arith.constant 0 : index
    %c128_34 = arith.constant 128 : index
    %81 = vector.load %arg7[%c0_33, %c128_34] : memref<8x768xf32, #tpu.memory_space<vmem>>, vector<8x512xf32>
    %c0_35 = arith.constant 0 : index
    %c129_36 = arith.constant 129 : index
    %82 = vector.load %arg7[%c0_35, %c129_36] : memref<8x768xf32, #tpu.memory_space<vmem>>, vector<8x512xf32>
    %83 = vector.broadcast %22 : vector<1x512xf32> to vector<8x512xf32>
    %84 = arith.mulf %82, %83 : vector<8x512xf32>
    %c0_37 = arith.constant 0 : index
    %c143_38 = arith.constant 143 : index
    %85 = vector.load %arg7[%c0_37, %c143_38] : memref<8x768xf32, #tpu.memory_space<vmem>>, vector<8x512xf32>
    %86 = vector.broadcast %25 : vector<1x512xf32> to vector<8x512xf32>
    %87 = arith.mulf %85, %86 : vector<8x512xf32>
    %c0_39 = arith.constant 0 : index
    %c144_40 = arith.constant 144 : index
    %88 = vector.load %arg7[%c0_39, %c144_40] : memref<8x768xf32, #tpu.memory_space<vmem>>, vector<8x512xf32>
    %89 = vector.broadcast %14 : vector<1x512xf32> to vector<8x512xf32>
    %90 = arith.mulf %88, %89 : vector<8x512xf32>
    %c0_41 = arith.constant 0 : index
    %c145_42 = arith.constant 145 : index
    %91 = vector.load %arg7[%c0_41, %c145_42] : memref<8x768xf32, #tpu.memory_space<vmem>>, vector<8x512xf32>
    %92 = vector.broadcast %26 : vector<1x512xf32> to vector<8x512xf32>
    %93 = arith.mulf %91, %92 : vector<8x512xf32>
    %94 = tpu.concatenate %71, %74, %77, %80, %81, %84, %87, %90, %93 in 0 : vector<8x512xf32>, vector<8x512xf32>, vector<8x512xf32>, vector<8x512xf32>, vector<8x512xf32>, vector<8x512xf32>, vector<8x512xf32>, vector<8x512xf32>, vector<8x512xf32> -> vector<72x512xf32>
    %95 = arith.truncf %94 : vector<72x512xf32> to vector<72x512xbf16>
    %cst_43 = arith.constant dense<0.000000e+00> : vector<8x512xf32>
    %96 = tpu.matmul %68, %95, %cst_43 {dimension_numbers = #tpu.dot_dimension_numbers<[1], [0], [0], [1], [0, 0, 1, 1], [], []>} : vector<8x72xbf16>, vector<72x512xbf16>, vector<8x512xf32> -> vector<8x512xf32>
    %c0_44 = arith.constant 0 : index
    %c0_45 = arith.constant 0 : index
    %97 = vector.load %arg5[%c0_44, %c0_45] : memref<8x1xf32, #tpu.memory_space<vmem>>, vector<8x1xf32>
    %98 = vector.broadcast %97 : vector<8x1xf32> to vector<8x512xf32>
    %99 = arith.addf %96, %98 : vector<8x512xf32>
    %100 = arith.addf %99, %62 : vector<8x512xf32>
    %101 = tpu.iota {dimensions = array<i32: 0>} : vector<256x64xi32>
    %102 = tpu.iota {dimensions = array<i32: 1>} : vector<256x64xi32>
    %c4_i32_46 = arith.constant 4 : i32
    %103 = vector.broadcast %c4_i32_46 : i32 to vector<256x64xi32>
    %104 = arith.shrsi %101, %103 : vector<256x64xi32>
    %c15_i32_47 = arith.constant 15 : i32
    %105 = vector.broadcast %c15_i32_47 : i32 to vector<256x64xi32>
    %106 = arith.andi %104, %105 : vector<256x64xi32>
    %c15_i32_48 = arith.constant 15 : i32
    %107 = vector.broadcast %c15_i32_48 : i32 to vector<256x64xi32>
    %108 = arith.andi %101, %107 : vector<256x64xi32>
    %c3_i32 = arith.constant 3 : i32
    %109 = vector.broadcast %c3_i32 : i32 to vector<256x64xi32>
    %110 = arith.shrsi %102, %109 : vector<256x64xi32>
    %c7_i32 = arith.constant 7 : i32
    %111 = vector.broadcast %c7_i32 : i32 to vector<256x64xi32>
    %112 = arith.andi %102, %111 : vector<256x64xi32>
    %c1_i32_49 = arith.constant 1 : i32
    %113 = vector.broadcast %c1_i32_49 : i32 to vector<256x64xi32>
    %114 = arith.shrsi %106, %113 : vector<256x64xi32>
    %115 = arith.cmpi eq, %114, %110 : vector<256x64xi32>
    %c1_i32_50 = arith.constant 1 : i32
    %116 = vector.broadcast %c1_i32_50 : i32 to vector<256x64xi32>
    %117 = arith.shrsi %108, %116 : vector<256x64xi32>
    %118 = arith.cmpi eq, %117, %112 : vector<256x64xi32>
    %119 = arith.andi %115, %118 : vector<256x64xi1>
    %120 = arith.extui %119 : vector<256x64xi1> to vector<256x64xi32>
    %121 = arith.sitofp %120 : vector<256x64xi32> to vector<256x64xf32>
    %cst_51 = arith.constant 2.500000e-01 : f32
    %122 = vector.broadcast %cst_51 : f32 to vector<256x64xf32>
    %123 = arith.mulf %121, %122 : vector<256x64xf32>
    %124 = vector.extract_strided_slice %100 {offsets = [0, 0], sizes = [8, 256], strides = [1, 1]} : vector<8x512xf32> to vector<8x256xf32>
    %cst_52 = arith.constant dense<0.000000e+00> : vector<8x64xf32>
    %125 = tpu.matmul %124, %123, %cst_52 {dimension_numbers = #tpu.dot_dimension_numbers<[1], [0], [0], [1], [0, 0, 1, 1], [], []>} : vector<8x256xf32>, vector<256x64xf32>, vector<8x64xf32> -> vector<8x64xf32>
    %cst_53 = arith.constant 0.000000e+00 : f32
    %126 = vector.broadcast %cst_53 : f32 to vector<8x64xf32>
    %127 = arith.maximumf %125, %126 : vector<8x64xf32>
    %c0_54 = arith.constant 0 : index
    %c0_55 = arith.constant 0 : index
    %128 = vector.load %arg6[%c0_54, %c0_55] : memref<8x128xf32, #tpu.memory_space<vmem>>, vector<8x64xf32>
    tpu.vector_store %arg6[%c0_54, %c0_55], %127 {strides = array<i32>} : memref<8x128xf32, #tpu.memory_space<vmem>>, vector<8x64xf32>,
    %129 = vector.extract_strided_slice %100 {offsets = [0, 256], sizes = [8, 256], strides = [1, 1]} : vector<8x512xf32> to vector<8x256xf32>
    %cst_56 = arith.constant dense<0.000000e+00> : vector<8x64xf32>
    %130 = tpu.matmul %129, %123, %cst_56 {dimension_numbers = #tpu.dot_dimension_numbers<[1], [0], [0], [1], [0, 0, 1, 1], [], []>} : vector<8x256xf32>, vector<256x64xf32>, vector<8x64xf32> -> vector<8x64xf32>
    %cst_57 = arith.constant 0.000000e+00 : f32
    %131 = vector.broadcast %cst_57 : f32 to vector<8x64xf32>
    %132 = arith.maximumf %130, %131 : vector<8x64xf32>
    %c0_58 = arith.constant 0 : index
    %c64 = arith.constant 64 : index
    %133 = vector.load %arg6[%c0_58, %c64] : memref<8x128xf32, #tpu.memory_space<vmem>>, vector<8x64xf32>
    tpu.vector_store %arg6[%c0_58, %c64], %132 {strides = array<i32>} : memref<8x128xf32, #tpu.memory_space<vmem>>, vector<8x64xf32>,
    return
  }
  func.func @transform_0(%arg0: i32) -> (i32, i32) {
    %c0_i32 = arith.constant 0 : i32
    %c0_i32_0 = arith.constant 0 : i32
    %c0_i32_1 = arith.constant 0 : i32
    return %c0_i32, %c0_i32_0 : i32, i32
  }
  func.func @transform_1(%arg0: i32) -> (i32, i32) {
    %c0_i32 = arith.constant 0 : i32
    %c0_i32_0 = arith.constant 0 : i32
    %c0_i32_1 = arith.constant 0 : i32
    return %c0_i32, %c0_i32_0 : i32, i32
  }
  func.func @transform_2(%arg0: i32) -> (i32, i32) {
    %c0_i32 = arith.constant 0 : i32
    %c0_i32_0 = arith.constant 0 : i32
    %c0_i32_1 = arith.constant 0 : i32
    return %c0_i32, %c0_i32_0 : i32, i32
  }
  func.func @transform_3(%arg0: i32) -> (i32, i32) {
    %c0_i32 = arith.constant 0 : i32
    %c0_i32_0 = arith.constant 0 : i32
    %c0_i32_1 = arith.constant 0 : i32
    return %c0_i32, %c0_i32_0 : i32, i32
  }
  func.func @transform_4(%arg0: i32) -> (i32, i32) {
    %c0_i32 = arith.constant 0 : i32
    %c0_i32_0 = arith.constant 0 : i32
    %c0_i32_1 = arith.constant 0 : i32
    return %c0_i32, %c0_i32_0 : i32, i32
  }
  func.func @transform_5(%arg0: i32) -> (i32, i32) {
    %c0_i32 = arith.constant 0 : i32
    %c0_i32_0 = arith.constant 0 : i32
    %c0_i32_1 = arith.constant 0 : i32
    return %c0_i32, %c0_i32_0 : i32, i32
  }
}

</mosaic_0001>

<bundles_post_ra>
// kernel: tpu_custom_call.1
= control target key start
LH: loop header
LB: loop body
LE: loop exit
PB: predicated region body
PF: predicated region fallthrough
CT: control target
= control target key end

     0   :  { %10 = vsyncpa [#allocation4], 0  ;;  %s3239_s0 = inlined_call_operand.hbm [shape: f32[8,768], index: 0, kind: input, shape index: {}]   ;;  %s3240_s1 = inlined_call_operand.vmem [shape: bf16[16,72], index: 1, kind: input, shape index: {}]   ;;  %s3241_s2 = inlined_call_operand.vmem [shape: f32[16,1], index: 2, kind: input, shape index: {}]   ;;  %s3242_s3 = inlined_call_operand.vmem [shape: bf16[8,72], index: 3, kind: input, shape index: {}]   ;;  %s3243_s4 = inlined_call_operand.vmem [shape: f32[8,1], index: 4, kind: input, shape index: {}]   ;;  %s3244_s5 = inlined_call_operand.hbm [shape: f32[8,128], index: 5, kind: output, shape index: {}]  }
   0x1   :  { %11 = vsyncpa [#allocation5], 0  ;;  %s17_s20 = sshll.u32 %s3239_s0, 4  ;;  %s2041_s21 = smov [#allocation3]   ;;  %v3247_v0 = vlaneseq  ;;  %s18_s20 = int_to_ptr.hbm [resolvable:$true] %s17_s20 }
   0x2   :  { %s19_s22 = sshll.u32 %s2041_s21, 4  ;;  %s20_s22 = int_to_ptr.vmem [resolvable:$true] %s19_s22 }
   0x3   :  { %22 = dma.hbm_to_vmem [thread:$0]  %s18_s20, 768, %s20_s22, [#allocation4]  }
   0x4   :  { %2037 = dma.done.wait [#allocation4], 768  }
   0x5   :  { %2038 = vsyncadd [#allocation4], 4294966528  ;;  %v2093_v1 = vand.u32 127, %v3247_v0  ;;  %v3245_v8 = vmov 0.0   ;;  %s2043_s0 = smov 17   ;;  %s2044_s23 = smov 15  }
   0x6   :  { %s2045_s24 = smov 16   ;;  %s2046_s25 = smov 1   ;;  %v2149_v54 = vld [vmem:[#allocation3 + $0x10] sm:$0xff]  ;;  %v2151_v55 = vld [vmem:[#allocation3 + $0x18] sm:$0xff]  ;;  %v2159_v59 = vld [vmem:[#allocation3 + $0x8] sm:$0xff] }
   0x7   :  { %3264 = vst [vmem:[#allocation9_spill] sm:$0xff] %v2093_v1  ;;  %v41_v2 = vshra.s32 %v2093_v1, 4  ;;  %v49_v3 = vand.u32 15, %v2093_v1  ;;  %v39_v4 = vadd.s32 256, %v2093_v1  ;;  %v38_v5 = vadd.s32 128, %v2093_v1  ;;  %s2047_s26 = smov 113  }
   0x8   :  { %v40_v6 = vadd.s32 384, %v2093_v1  ;;  %s2048_s27 = smov 127   ;;  %s2049_s28 = smov 112   ;;  %v1832_v56 = vpack.i.bf16 %v2151_v55, %v2149_v54  ;;  %v2161_v60 = vld [vmem:[#allocation3 + $0x20] sm:$0xff] }
   0x9   :  { %v2100_v7 = vand.u32 15, %v41_v2  ;;  %vm89_vm0 = vcmp.le.s32.totalorder %v49_v3, 14  ;;  %vm77_vm1 = vcmp.ge.s32.totalorder %v49_v3, 1  ;;  %v43_v11 = vshra.s32 %v39_v4, 4  ;;  %s2050_s29 = smov 111   ;;  %s2051_s30 = smov 95  }
   0xa   :  { %v2103_v9 = vsel %vm89_vm0, 1.0, %v3245_v8  ;;  %v2106_v10 = vsel %vm77_vm1, 1.0, %v3245_v8  ;;  %v51_v12 = vand.u32 15, %v39_v4  ;;  %v42_v13 = vshra.s32 %v38_v5, 4  ;;  %s2052_s6 = smov 110   ;;  %s2053_s7 = smov 96  }
   0xb   :  { %vm65_vm2 = vcmp.le.s32.totalorder %v2100_v7, 14  ;;  %v50_v14 = vand.u32 15, %v38_v5  ;;  %v44_v15 = vshra.s32 %v40_v6, 4  ;;  %v47_v17 = vand.u32 15, %v43_v11  ;;  %s2054_s8 = smov 94   ;;  %s2055_s9 = smov 126  }
   0xc   :  { %v1717_v16 = vsel %vm65_vm2, 1.0, %v3245_v8  ;;  %vm91_vm3 = vcmp.le.s32.totalorder %v51_v12, 14  ;;  %v52_v18 = vand.u32 15, %v40_v6  ;;  %v46_v22 = vand.u32 15, %v42_v13  ;;  %s1703_s21 = sshll.u32 %s3244_s5, 4  ;;  %s1704_s21 = int_to_ptr.hbm [resolvable:$true] %s1703_s21 }
   0xd   :  { %v113_v19 = vmul.f32 %v2103_v9, %v1717_v16  ;;  %v109_v20 = vmul.f32 %v2106_v10, %v1717_v16  ;;  %v1727_v21 = vsel %vm91_vm3, 1.0, %v3245_v8  ;;  %vm67_vm4 = vcmp.le.s32.totalorder %v47_v17, 14 }
   0xe   :  { %vm90_vm5 = vcmp.le.s32.totalorder %v50_v14, 14  ;;  %v48_v23 = vand.u32 15, %v44_v15  ;;  %v1719_v24 = vsel %vm67_vm4, 1.0, %v3245_v8  ;;  %vm66_vm6 = vcmp.le.s32.totalorder %v46_v22, 14 }
   0xf   :  { %315 = vrot.lane.b32.xlu0 %v113_v19, %s2043_s0  ;;  %263 = vrot.lane.b32.xlu2 %v109_v20, %s2044_s23  ;;  %v1726_v25 = vsel %vm90_vm5, 1.0, %v3245_v8  ;;  %vm92_vm7 = vcmp.le.s32.totalorder %v52_v18, 14  ;;  %v115_v26 = vmul.f32 %v1727_v21, %v1719_v24  ;;  %v1718_v27 = vsel %vm66_vm6, 1.0, %v3245_v8 }
  0x10   :  { %vm68_vm8 = vcmp.le.s32.totalorder %v48_v23, 14  ;;  %vm78_vm9 = vcmp.ge.s32.totalorder %v50_v14, 1  ;;  %v114_v29 = vmul.f32 %v1726_v25, %v1718_v27  ;;  %v1728_v31 = vsel %vm92_vm7, 1.0, %v3245_v8 }
  0x11   :  { %v2119_v28 = vsel %vm78_vm9, 1.0, %v3245_v8  ;;  %319 = vrot.lane.b32.xlu1 %v115_v26, %s2043_s0  ;;  %v1720_v30 = vsel %vm68_vm8, 1.0, %v3245_v8  ;;  %vm79_vm10 = vcmp.ge.s32.totalorder %v51_v12, 1  ;;  %vm80_vm11 = vcmp.ge.s32.totalorder %v52_v18, 1 }
  0x12   :  { %v110_v32 = vmul.f32 %v2119_v28, %v1718_v27  ;;  %v116_v33 = vmul.f32 %v1728_v31, %v1720_v30  ;;  %v1723_v34 = vsel %vm79_vm10, 1.0, %v3245_v8  ;;  %v1724_v36 = vsel %vm80_vm11, 1.0, %v3245_v8 }
  0x13   :  { %v111_v35 = vmul.f32 %v1723_v34, %v1719_v24  ;;  %v1792_v37 = vpack.i.bf16 %v1718_v27, %v1717_v16  ;;  %v112_v38 = vmul.f32 %v1724_v36, %v1720_v30  ;;  %v1797_v39 = vpack.i.bf16 %v1720_v30, %v1719_v24 }
  0x14   :  { %v1807_v40 = vpack.i.bf16 %v1728_v31, %v1727_v21  ;;  %vm54_vm12 = vcmp.ge.s32.totalorder %v46_v22, 1  ;;  %vm56_vm13 = vcmp.ge.s32.totalorder %v48_v23, 1  ;;  %v1802_v41 = vpack.i.bf16 %v1726_v25, %v2103_v9 }
  0x15   :  { %vm55_vm14 = vcmp.ge.s32.totalorder %v47_v17, 1  ;;  %v1714_v42 = vsel %vm54_vm12, 1.0, %v3245_v8  ;;  %v1716_v43 = vsel %vm56_vm13, 1.0, %v3245_v8  ;;  %v1812_v48 = vpack.i.bf16 %v1723_v34, %v2119_v28 }
  0x16   :  { %v1715_v44 = vsel %vm55_vm14, 1.0, %v3245_v8  ;;  %v106_v45 = vmul.f32 %v1726_v25, %v1714_v42  ;;  %v108_v46 = vmul.f32 %v1728_v31, %v1716_v43  ;;  %v1817_v50 = vpack.i.bf16 %v2106_v10, %v1724_v36 }
  0x17   :  { %317 = vrot.lane.b32.xlu0 %v114_v29, %s2043_s0  ;;  %265 = vrot.lane.b32.xlu2 %v110_v32, %s2044_s23  ;;  %v107_v47 = vmul.f32 %v1727_v21, %v1715_v44  ;;  %v1822_v49 = vpack.i.bf16 %v1715_v44, %v1714_v42  ;;  %vm53_vm15 = vcmp.ge.s32.totalorder %v2100_v7, 1  ;;  %v104_v57 = vmul.f32 %v1724_v36, %v1716_v43 }
  0x18   :  { %v2143_v51 = vsel %vm53_vm15, 1.0, %v3245_v8  ;;  %v1837_v61 = vpack.i.bf16 %v2159_v59, %v2161_v60  ;;  %v103_v63 = vmul.f32 %v1723_v34, %v1715_v44  ;;  %v102_v2 = vmul.f32 %v2119_v28, %v1714_v42 }
  0x19   :  { %321 = vrot.lane.b32.xlu1 %v116_v33, %s2043_s0  ;;  %v1827_v52 = vpack.i.bf16 %v2143_v51, %v1716_v43  ;;  %v105_v53 = vmul.f32 %v2103_v9, %v2143_v51  ;;  %vm245_vm0 = vcmask 7168   ;;  %v2181_v9 = vld [vmem:[#allocation3 + $0x28] sm:$0xff]  ;;  %vm297_vm1 = vcmask 130048  }
  0x1a   :  { %vm214_vm2 = vcmask 1039360   ;;  %vm162_vm3 = vcmask 916480   ;;  %vm271_vm4 = vcmask 121856   ;;  %vm323_vm5 = vcmask 138240  }
  0x1b   :  { %vm188_vm6 = vcmask 924672   ;;  %vm136_vm7 = vcmask 908288   ;;  %vm445_vm8 = vcmask 900096   ;;  %vm520_vm9 = vcmask 769024  }
  0x1c   :  { %vm470_vm10 = vcmask 785408   ;;  %vm495_vm11 = vcmask 777216   ;;  %vm376_vm12 = vcmask 1031168   ;;  %vm688_vm13 = vcmask 1043456  }
  0x1d   :  { %vm684_vm14 = vcmask 588800  }
  0x1f   :  { %267 = vrot.lane.b32.xlu0 %v111_v35, %s2044_s23  ;;  %1793 = vrot.lane.b32.xlu2 %v1792_v37, %s2045_s24 }
  0x21   :  { %269 = vrot.lane.b32.xlu1 %v112_v38, %s2044_s23 }
  0x27   :  { %1798 = vrot.lane.b32.xlu0 %v1797_v39, %s2045_s24  ;;  %1808 = vrot.lane.b32.xlu2 %v1807_v40, %s2046_s25 }
  0x29   :  { %1803 = vrot.lane.b32.xlu1 %v1802_v41, %s2046_s25 }
  0x2f   :  { %182 = vrot.lane.b32.xlu0 %v106_v45, %s2047_s26  ;;  %186 = vrot.lane.b32.xlu2 %v108_v46, %s2047_s26 }
  0x31   :  { %184 = vrot.lane.b32.xlu1 %v107_v47, %s2047_s26 }
  0x37   :  { %1813 = vrot.lane.b32.xlu0 %v1812_v48, %s2048_s27  ;;  %1823 = vrot.lane.b32.xlu2 %v1822_v49, %s2049_s28 }
  0x39   :  { %1818 = vrot.lane.b32.xlu1 %v1817_v50, %s2048_s27 }
  0x3f   :  { %1828 = vrot.lane.b32.xlu0 %v1827_v52, %s2049_s28  ;;  %132 = vrot.lane.b32.xlu2 %v103_v63, %s2050_s29 }
  0x41   :  { %180 = vrot.lane.b32.xlu1 %v105_v53, %s2047_s26 }
  0x47   :  { %1833 = vrot.lane.b32.xlu0 %v1832_v56, %s2050_s29 }
  0x49   :  { %1838 = vrot.lane.b32.xlu1 %v1837_v61, %s2050_s29 }
  0x4f   :  { %134 = vrot.lane.b32.xlu0 %v104_v57, %s2050_s29 }
  0x51   :  { %130 = vrot.lane.b32.xlu1 %v102_v2, %s2050_s29 }
  0x69   :  { %v2157_v58 = vpop.permute.xlu2 %263 }
  0x6a   :  { %v280_v36 = vmul.f32 %v2157_v58, %v2159_v59 }
  0x71   :  { %v2166_v62 = vpop.permute.xlu2 %265 }
  0x79   :  { %v2171_v3 = vpop.permute.xlu2 %1793 }
  0x7a   :  { %v2174_v4 = vunpack.i.l.bf16 %v2171_v3  ;;  %v1796_v48 = vunpack.i.h.bf16 %v2171_v3 }
  0x7c   :  { %v306_v5 = vmul.f32 %v2174_v4, %v2159_v59 }
  0x7e   :  { %485 = vrot.lane.b32.xlu2 %v306_v5, %s2051_s30 }
  0x81   :  { %v2179_v6 = vpop.permute.xlu0 %315  ;;  %v1809_v7 = vpop.permute.xlu2 %1808 }
  0x82   :  { %v2183_v11 = vunpack.i.h.bf16 %v1809_v7  ;;  %v1810_v12 = vunpack.i.l.bf16 %v1809_v7  ;;  %v2267_v7 = vsel %vm297_vm1, %v2174_v4, %v1796_v48 }
  0x83   :  { %v2185_v13 = vpop.permute.xlu1 %319 }
  0x84   :  { %3265 = vst [vmem:[#allocation10_spill] sm:$0xff] %v2183_v11  ;;  %v2189_v14 = vsel %vm245_vm0, %v1810_v12, %v2183_v11  ;;  %v258_v15 = vmul.f32 %v2183_v11, %v2181_v9 }
  0x85   :  { %v257_v16 = vmul.f32 %v2189_v14, %v2161_v60 }
  0x87   :  { %v1847_v17 = vpack.i.bf16 %v258_v15, %v257_v16  ;;  %v101_v15 = vmul.f32 %v2106_v10, %v2143_v51 }
  0x89   :  { %v2195_v18 = vpop.permute.xlu0 %317  ;;  %1848 = vrot.lane.b32.xlu0 %v1847_v17, %s2052_s6  ;;  %v2234_v39 = vpop.permute.xlu2 %186 }
  0x8a   :  { %3268 = vst [vmem:[#allocation13_spill] sm:$0xff] %v2234_v39 }
  0x8b   :  { %v2198_v19 = vpop.permute.xlu1 %321 }
  0x91   :  { %v2200_v20 = vpop.permute.xlu0 %267  ;;  %v1824_v3 = vpop.permute.xlu2 %1823 }
  0x92   :  { %v1826_v16 = vunpack.i.h.bf16 %v1824_v3  ;;  %v1825_v17 = vunpack.i.l.bf16 %v1824_v3 }
  0x93   :  { %v2202_v21 = vpop.permute.xlu1 %269 }
  0x94   :  { %v2289_v10 = vsel %vm162_vm3, %v1825_v17, %v1826_v16 }
  0x95   :  { %3273 = vst [vmem:[#allocation18_spill] sm:$0xff] %v2289_v10 }
  0x99   :  { %v1799_v22 = vpop.permute.xlu0 %1798 }
  0x9a   :  { %v2222_v33 = vunpack.i.h.bf16 %v1799_v22  ;;  %v1800_v34 = vunpack.i.l.bf16 %v1799_v22 }
  0x9b   :  { %v1804_v23 = vpop.permute.xlu1 %1803 }
  0x9c   :  { %v1806_v24 = vunpack.i.h.bf16 %v1804_v23  ;;  %v2204_v25 = vunpack.i.l.bf16 %v1804_v23  ;;  %v2231_v37 = vsel %vm297_vm1, %v1800_v34, %v2222_v33  ;;  %v310_v43 = vmul.f32 %v2222_v33, %v2181_v9 }
  0x9d   :  { %v309_v42 = vmul.f32 %v2231_v37, %v2161_v60  ;;  %v307_v23 = vmul.f32 %v2267_v7, %v2149_v54 }
  0x9e   :  { %3266 = vst [vmem:[#allocation11_spill] sm:$0xff] %v2204_v25  ;;  %v2208_v26 = vsel %vm245_vm0, %v2204_v25, %v1806_v24  ;;  %v2211_v27 = vsel %vm245_vm0, %v1806_v24, %v1810_v12  ;;  %v254_v28 = vmul.f32 %v2204_v25, %v2159_v59  ;;  %v2270_v12 = vsel %vm297_vm1, %v1796_v48, %v1800_v34 }
  0x9f   :  { %3267 = vst [vmem:[#allocation12_spill] sm:$0xff] %v2211_v27  ;;  %v255_v29 = vmul.f32 %v2208_v26, %v2149_v54  ;;  %v256_v30 = vmul.f32 %v2211_v27, %v2151_v55  ;;  %v1867_v53 = vpack.i.bf16 %v310_v43, %v309_v42  ;;  %v308_v24 = vmul.f32 %v2270_v12, %v2151_v55 }
  0xa0   :  { %435 = vrot.lane.b32.xlu1 %v254_v28, %s2052_s6  ;;  %v2285_v28 = vsel %vm271_vm4, %v2166_v62, %v2200_v20  ;;  %v2305_v34 = vsel %vm323_vm5, %v2185_v13, %v2198_v19 }
  0xa1   :  { %v2220_v31 = vpop.permute.xlu0 %182  ;;  %v1842_v32 = vpack.i.bf16 %v256_v30, %v255_v29  ;;  %v2298_v29 = vsel %vm271_vm4, %v2157_v58, %v2166_v62  ;;  %v332_v30 = vmul.f32 %v2179_v6, %v2159_v59  ;;  %v173_v62 = vmul.f32 %v2149_v54, %v2289_v10 }
  0xa2   :  { %v335_v43 = vmul.f32 %v2305_v34, %v2161_v60 }
  0xa3   :  { %v2224_v35 = vpop.permute.xlu1 %184  ;;  %1843 = vrot.lane.b32.xlu2 %v1842_v32, %s2052_s6  ;;  %v1862_v32 = vpack.i.bf16 %v308_v24, %v307_v23  ;;  %v2363_v24 = vsel %vm271_vm4, %v2200_v20, %v2202_v21  ;;  %v284_v20 = vmul.f32 %v2202_v21, %v2181_v9 }
  0xa8   :  { %460 = vrot.lane.b32.xlu1 %v280_v36, %s2053_s7  ;;  %v282_v36 = vmul.f32 %v2285_v28, %v2151_v55 }
  0xa9   :  { %v1814_v38 = vpop.permute.xlu0 %1813 }
  0xaa   :  { %v1816_v40 = vunpack.i.h.bf16 %v1814_v38  ;;  %v1815_v41 = vunpack.i.l.bf16 %v1814_v38 }
  0xab   :  { %v1819_v44 = vpop.permute.xlu1 %1818 }
  0xac   :  { %v2241_v45 = vsel %vm214_vm2, %v1815_v41, %v1816_v40  ;;  %v2243_v46 = vunpack.i.h.bf16 %v1819_v44  ;;  %v2245_v47 = vunpack.i.l.bf16 %v1819_v44  ;;  %v336_v44 = vmul.f32 %v2198_v19, %v2181_v9 }
  0xad   :  { %3269 = vst [vmem:[#allocation14_spill] sm:$0xff] %v2241_v45  ;;  %v225_v49 = vmul.f32 %v2149_v54, %v2241_v45 }
  0xae   :  { %3270 = vst [vmem:[#allocation15_spill] sm:$0xff] %v2245_v47  ;;  %v2252_v50 = vsel %vm214_vm2, %v1816_v40, %v2245_v47  ;;  %v2256_v52 = vsel %vm214_vm2, %v2243_v46, %v1815_v41  ;;  %v227_v56 = vmul.f32 %v2245_v47, %v2161_v60  ;;  %v281_v40 = vmul.f32 %v2298_v29, %v2149_v54 }
  0xaf   :  { %3271 = vst [vmem:[#allocation16_spill] sm:$0xff] %v2252_v50  ;;  %v226_v57 = vmul.f32 %v2252_v50, %v2151_v55  ;;  %v224_v61 = vmul.f32 %v2159_v59, %v2256_v52 }
  0xb0   :  { %1868 = vrot.lane.b32.xlu1 %v1867_v53, %s2051_s30  ;;  %v1892_v48 = vpack.i.bf16 %v282_v36, %v281_v40  ;;  %v283_v36 = vmul.f32 %v2363_v24, %v2161_v60 }
  0xb1   :  { %v1852_v63 = vpack.i.bf16 %v226_v57, %v225_v49  ;;  %v1857_v2 = vpack.i.bf16 %v224_v61, %v227_v56  ;;  %v1829_v5 = vpop.permute.xlu0 %1828  ;;  %v1882_v57 = vpack.i.bf16 %v336_v44, %v335_v43  ;;  %v2338_v61 = vsel %vm323_vm5, %v2179_v6, %v2195_v18 }
  0xb2   :  { %v2276_v22 = vunpack.i.l.bf16 %v1829_v5  ;;  %v2319_v42 = vunpack.i.h.bf16 %v1829_v5  ;;  %v1897_v40 = vpack.i.bf16 %v284_v20, %v283_v36 }
  0xb3   :  { %1853 = vrot.lane.b32.xlu2 %v1852_v63, %s2049_s28  ;;  %1858 = vrot.lane.b32.xlu0 %v1857_v2, %s2049_s28  ;;  %v2317_v41 = vpop.permute.xlu1 %180  ;;  %v2343_v63 = vsel %vm323_vm5, %v2195_v18, %v2185_v13  ;;  %v201_v2 = vmul.f32 %v2161_v60, %v2234_v39  ;;  %v333_v13 = vmul.f32 %v2338_v61, %v2149_v54 }
  0xb4   :  { %3272 = vst [vmem:[#allocation17_spill] sm:$0xff] %v2276_v22  ;;  %v2293_v51 = vsel %vm162_vm3, %v1826_v16, %v2276_v22  ;;  %v2328_v49 = vsel %vm188_vm6, %v2317_v41, %v2220_v31  ;;  %v2332_v56 = vsel %vm162_vm3, %v2319_v42, %v1825_v17  ;;  %v334_v18 = vmul.f32 %v2343_v63, %v2151_v55 }
  0xb5   :  { %3274 = vst [vmem:[#allocation19_spill] sm:$0xff] %v2293_v51  ;;  %v174_v38 = vmul.f32 %v2293_v51, %v2151_v55  ;;  %v198_v3 = vmul.f32 %v2159_v59, %v2328_v49  ;;  %v172_v5 = vmul.f32 %v2159_v59, %v2332_v56 }
  0xb6   :  { %v1877_v23 = vpack.i.bf16 %v334_v18, %v333_v13 }
  0xb7   :  { %v1872_v53 = vpack.i.bf16 %v174_v38, %v173_v62  ;;  %v1907_v16 = vpack.i.bf16 %v198_v3, %v201_v2 }
  0xb8   :  { %128 = vrot.lane.b32.xlu1 %v101_v15, %s2050_s29  ;;  %v175_v15 = vmul.f32 %v2276_v22, %v2161_v60 }
  0xba   :  { %v1887_v17 = vpack.i.bf16 %v172_v5, %v175_v15 }
  0xbb   :  { %510 = vrot.lane.b32.xlu2 %v332_v30, %s2054_s8  ;;  %1863 = vrot.lane.b32.xlu0 %v1862_v32, %s2051_s30  ;;  %v2368_v30 = vsel %vm188_vm6, %v2224_v35, %v2234_v39  ;;  %v2373_v32 = vsel %vm188_vm6, %v2220_v31, %v2224_v35  ;;  %v1834_v31 = vpop.permute.xlu0 %1833  ;;  %v2387_v35 = vpop.permute.xlu2 %132 }
  0xbc   :  { %v200_v62 = vmul.f32 %v2368_v30, %v2151_v55  ;;  %v199_v38 = vmul.f32 %v2149_v54, %v2373_v32  ;;  %v1839_v9 = vpop.permute.xlu1 %1838  ;;  %v1835_v2 = vunpack.i.l.bf16 %v1834_v31 }
  0xbe   :  { %v1902_v43 = vpack.i.bf16 %v200_v62, %v199_v38 }
  0xc0   :  { %1893 = vrot.lane.b32.xlu1 %v1892_v48, %s2053_s7 }
  0xc3   :  { %1873 = vrot.lane.b32.xlu2 %v1872_v53, %s2048_s27  ;;  %1883 = vrot.lane.b32.xlu0 %v1882_v57, %s2054_s8  ;;  %v2389_v44 = vpop.permute.xlu0 %134  ;;  %v1836_v53 = vunpack.i.h.bf16 %v1834_v31  ;;  %v1840_v57 = vunpack.i.l.bf16 %v1839_v9 }
  0xc4   :  { %v2401_v31 = vpop.permute.xlu1 %130 }
  0xc5   :  { %v423_v20 = vsel %vm136_vm7, %v1835_v2, %v1836_v53 }
  0xc8   :  { %1908 = vrot.lane.b32.xlu1 %v1907_v16, %s2055_s9  ;;  %v424_v16 = vsel %vm136_vm7, %v1836_v53, %v1840_v57 }
  0xcb   :  { %1878 = vrot.lane.b32.xlu2 %v1877_v23, %s2054_s8  ;;  %1888 = vrot.lane.b32.xlu0 %v1887_v17, %s2048_s27 }
  0xd3   :  { %1898 = vrot.lane.b32.xlu2 %v1897_v40, %s2053_s7  ;;  %1903 = vrot.lane.b32.xlu0 %v1902_v43, %s2055_s9 }
  0xd8   :  { %v2391_v48 = vpop.permute.xlu2 %485 }
  0xfb   :  { %v1849_v3 = vpop.permute.xlu0 %1848 }
  0xfc   :  { %v1851_v5 = vunpack.i.h.bf16 %v1849_v3  ;;  %v1850_v15 = vunpack.i.l.bf16 %v1849_v3 }
  0xfd   :  { %v1844_v13 = vpop.permute.xlu2 %1843 }
  0xfe   :  { %v449_v18 = vsel %vm445_vm8, %v1850_v15, %v1851_v5  ;;  %v1846_v17 = vunpack.i.h.bf16 %v1844_v13  ;;  %v1845_v23 = vunpack.i.l.bf16 %v1844_v13  ;;  %v1841_v5 = vunpack.i.h.bf16 %v1839_v9 }
  0xff   :  { %v544_v36 = vpack.c.bf16 %v449_v18, %v1840_v57  ;;  %v2419_v9 = vsel %vm136_vm7, %v2401_v31, %v2387_v35 }
 0x100   :  { %v448_v62 = vsel %vm445_vm8, %v1846_v17, %v1850_v15  ;;  %v447_v38 = vsel %vm445_vm8, %v1845_v23, %v1846_v17  ;;  %v422_v53 = vsel %vm136_vm7, %v1841_v5, %v1835_v2  ;;  %3275 = vst [vmem:[#allocation20_spill] sm:$0xff] %v2419_v9 }
 0x101   :  { %625 = vrot.lane.b32.xlu2 %v544_v36, %s2043_s0  ;;  %v543_v40 = vpack.c.bf16 %v448_v62, %v424_v16  ;;  %v542_v43 = vpack.c.bf16 %v447_v38, %v423_v20  ;;  %v147_v62 = vmul.f32 %v2149_v54, %v2419_v9 }
 0x103   :  { %623 = vrot.lane.b32.xlu1 %v543_v40, %s2043_s0  ;;  %621 = vrot.lane.b32.xlu0 %v542_v43, %s2043_s0 }
 0x10d   :  { %v2403_v3 = vpop.permute.xlu2 %1853 }
 0x112   :  { %v436_v57 = vpop.permute.xlu1 %435 }
 0x113   :  { %v446_v15 = vsel %vm445_vm8, %v436_v57, %v1845_v23  ;;  %v2407_v13 = vpack.c.bf16 %v436_v57, %v1841_v5 }
 0x114   :  { %v541_v18 = vpack.c.bf16 %v446_v15, %v422_v53 }
 0x115   :  { %v2409_v17 = vpop.permute.xlu2 %510 }
 0x116   :  { %619 = vrot.lane.b32.xlu1 %v541_v18, %s2043_s0 }
 0x11a   :  { %v2412_v16 = vpop.permute.xlu1 %460 }
 0x11d   :  { %v2421_v2 = vpop.permute.xlu2 %1873 }
 0x11e   :  { %v3249_v23 = vunpack.i.h.bf16 %v2421_v2  ;;  %v3248_v20 = vunpack.i.l.bf16 %v2421_v2 }
 0x120   :  { %v354_v38 = vsel %vm214_vm2, %v3248_v20, %v3249_v23 }
 0x121   :  { %v532_v40 = vpack.c.bf16 %v354_v38, %v147_v62 }
 0x122   :  { %v2432_v43 = vpop.permute.xlu1 %1868 }
 0x123   :  { %601 = vrot.lane.b32.xlu2 %v532_v40, %s2043_s0 }
 0x125   :  { %v1879_v5 = vpop.permute.xlu2 %1878  ;;  %v2435_v57 = vpop.permute.xlu0 %1858 }
 0x126   :  { %v1881_v53 = vunpack.i.h.bf16 %v1879_v5  ;;  %v1880_v15 = vunpack.i.l.bf16 %v1879_v5  ;;  %v1860_v50 = vunpack.i.l.bf16 %v2435_v57 }
 0x128   :  { %v522_v18 = vsel %vm520_vm9, %v1880_v15, %v1881_v53 }
 0x129   :  { %v552_v54 = vpack.c.bf16 %v522_v18, %v522_v18 }
 0x12a   :  { %v2438_v8 = vpop.permute.xlu1 %128 }
 0x12b   :  { %641 = vrot.lane.b32.xlu2 %v552_v54, %s2043_s0 }
 0x12d   :  { %v2441_v0 = vpop.permute.xlu0 %1863  ;;  %v1899_v25 = vpop.permute.xlu2 %1898 }
 0x12e   :  { %v1866_v62 = vunpack.i.h.bf16 %v2441_v0  ;;  %v3260_v38 = vunpack.i.l.bf16 %v2441_v0  ;;  %v1901_v10 = vunpack.i.h.bf16 %v1899_v25 }
 0x130   :  { %v497_v54 = vsel %vm495_vm11, %v3260_v38, %v1866_v62 }
 0x132   :  { %v2445_v40 = vpop.permute.xlu1 %1893 }
 0x133   :  { %v1896_v36 = vunpack.i.h.bf16 %v2445_v40  ;;  %v1895_v20 = vunpack.i.l.bf16 %v2445_v40  ;;  %v1900_v40 = vunpack.i.l.bf16 %v1899_v25 }
 0x135   :  { %v1884_v5 = vpop.permute.xlu0 %1883  ;;  %v472_v18 = vsel %vm470_vm10, %v1895_v20, %v1896_v36  ;;  %v474_v25 = vsel %vm470_vm10, %v1900_v40, %v1901_v10 }
 0x136   :  { %v1886_v23 = vunpack.i.h.bf16 %v1884_v5  ;;  %v1885_v1 = vunpack.i.l.bf16 %v1884_v5  ;;  %v547_v9 = vpack.c.bf16 %v497_v54, %v472_v18  ;;  %v521_v5 = vsel %vm520_vm9, %v2409_v17, %v1880_v15 }
 0x137   :  { %v1871_v18 = vunpack.i.h.bf16 %v2432_v43  ;;  %v1856_v15 = vunpack.i.h.bf16 %v2403_v3 }
 0x138   :  { %631 = vrot.lane.b32.xlu2 %v547_v9, %s2043_s0  ;;  %v524_v22 = vsel %vm520_vm9, %v1885_v1, %v1886_v23  ;;  %v1870_v9 = vunpack.i.l.bf16 %v2432_v43  ;;  %v523_v47 = vsel %vm520_vm9, %v1881_v53, %v1885_v1  ;;  %v1855_v43 = vunpack.i.l.bf16 %v2403_v3 }
 0x139   :  { %v554_v51 = vpack.c.bf16 %v524_v22, %v524_v22  ;;  %v551_v22 = vpack.c.bf16 %v521_v5, %v521_v5  ;;  %v553_v11 = vpack.c.bf16 %v523_v47, %v523_v47 }
 0x13a   :  { %v2455_v39 = vpop.permute.xlu1 %1908  ;;  %v499_v38 = vsel %vm495_vm11, %v1870_v9, %v1871_v18  ;;  %v404_v18 = vsel %vm162_vm3, %v1856_v15, %v1860_v50  ;;  %v403_v1 = vsel %vm162_vm3, %v1855_v43, %v1856_v15 }
 0x13b   :  { %v1910_v45 = vunpack.i.l.bf16 %v2455_v39  ;;  %645 = vrot.lane.b32.xlu1 %v554_v51, %s2043_s0  ;;  %v549_v51 = vpack.c.bf16 %v499_v38, %v474_v25  ;;  %v473_v25 = vsel %vm470_vm10, %v1896_v36, %v1900_v40  ;;  %v149_v36 = vmul.f32 %v2161_v60, %v2389_v44 }
 0x13d   :  { %v539_v54 = vpack.c.bf16 %v1860_v50, %v1910_v45  ;;  %v2464_v23 = vpop.permute.xlu0 %1888 }
 0x13e   :  { %v1890_v47 = vunpack.i.l.bf16 %v2464_v23 }
 0x13f   :  { %615 = vrot.lane.b32.xlu0 %v539_v54, %s2043_s0 }
 0x140   :  { %639 = vrot.lane.b32.xlu2 %v551_v22, %s2043_s0 }
 0x143   :  { %635 = vrot.lane.b32.xlu1 %v549_v51, %s2043_s0  ;;  %v534_v51 = vpack.c.bf16 %v1890_v47, %v149_v36 }
 0x145   :  { %v1904_v27 = vpop.permute.xlu0 %1903 }
 0x146   :  { %v1906_v5 = vunpack.i.h.bf16 %v1904_v27  ;;  %v1905_v10 = vunpack.i.l.bf16 %v1904_v27  ;;  %v1861_v27 = vunpack.i.h.bf16 %v2435_v57 }
 0x147   :  { %643 = vrot.lane.b32.xlu0 %v553_v11, %s2043_s0  ;;  %v1911_v11 = vunpack.i.h.bf16 %v2455_v39  ;;  %v1773_v39 = vld [vmem:[%s3240_s1] sm:$0xff] }
 0x148   :  { %v380_v54 = vsel %vm376_vm12, %v1906_v5, %v1910_v45  ;;  %v379_v38 = vsel %vm376_vm12, %v1905_v10, %v1906_v5  ;;  %v498_v45 = vsel %vm495_vm11, %v1866_v62, %v1870_v9  ;;  %v402_v40 = vsel %vm162_vm3, %v1861_v27, %v1855_v43 }
 0x149   :  { %v538_v53 = vpack.c.bf16 %v404_v18, %v380_v54  ;;  %v537_v22 = vpack.c.bf16 %v403_v1, %v379_v38  ;;  %v548_v50 = vpack.c.bf16 %v498_v45, %v473_v25  ;;  %v378_v3 = vsel %vm376_vm12, %v1911_v11, %v1905_v10  ;;  %v2503_v10 = vld [vmem:[#allocation3] sm:$0xff] }
 0x14a   :  { %v536_v15 = vpack.c.bf16 %v402_v40, %v378_v3  ;;  %v471_v62 = vsel %vm470_vm10, %v2412_v16, %v1895_v20  ;;  %v3276_v9 = vunpack.i.l.bf16 %v2441_v0  ;;  %v2509_v43 = vsel %vm136_vm7, %v2387_v35, %v2389_v44 }
 0x14b   :  { %613 = vrot.lane.b32.xlu2 %v538_v53, %s2043_s0  ;;  %611 = vrot.lane.b32.xlu1 %v537_v22, %s2043_s0  ;;  %v197_v20 = vmul.f32 %v2317_v41, %v2503_v10  ;;  %v223_v54 = vmul.f32 %v2243_v46, %v2503_v10  ;;  %v3277_v0 = vunpack.i.h.bf16 %v2421_v2  ;;  %v148_v38 = vmul.f32 %v2509_v43, %v2151_v55 }
 0x14c   :  { %v496_v60 = vsel %vm495_vm11, %v2391_v48, %v3276_v9  ;;  %v1891_v35 = vunpack.i.h.bf16 %v2464_v23  ;;  %v2527_v53 = vsel %vm136_vm7, %v2438_v8, %v2401_v31  ;;  %v550_v22 = vpack.c.bf16 %v2409_v17, %v2409_v17 }
 0x14d   :  { %v546_v5 = vpack.c.bf16 %v496_v60, %v471_v62  ;;  %v355_v18 = vsel %vm214_vm2, %v3277_v0, %v1890_v47  ;;  %v3278_v25 = vunpack.i.l.bf16 %v2421_v2  ;;  %v146_v45 = vmul.f32 %v2159_v59, %v2527_v53 }
 0x14e   :  { %v533_v1 = vpack.c.bf16 %v355_v18, %v148_v38  ;;  %v3279_v47 = vpack.c.bf16 %v2391_v48, %v2412_v16  ;;  %v171_v17 = vmul.f32 %v2319_v42, %v2503_v10 }
 0x14f   :  { %633 = vrot.lane.b32.xlu0 %v548_v50, %s2043_s0  ;;  %v353_v55 = vsel %vm214_vm2, %v1891_v35, %v3278_v25 }
 0x150   :  { %v531_v31 = vpack.c.bf16 %v353_v55, %v146_v45 }
 0x153   :  { %609 = vrot.lane.b32.xlu2 %v536_v15, %s2043_s0  ;;  %605 = vrot.lane.b32.xlu1 %v534_v51, %s2043_s0 }
 0x157   :  { %629 = vrot.lane.b32.xlu0 %v546_v5, %s2043_s0 }
 0x15b   :  { %391 = vrot.lane.b32.xlu2 %v223_v54, %s2049_s28  ;;  %366 = vrot.lane.b32.xlu1 %v197_v20, %s2055_s9  ;;  %v626_v2 = vpop.permute.xlu2 %625 }
 0x15f   :  { %603 = vrot.lane.b32.xlu0 %v533_v1, %s2043_s0 }
 0x163   :  { %627 = vrot.lane.b32.xlu2 %v3279_v47, %s2043_s0  ;;  %637 = vrot.lane.b32.xlu1 %v550_v22, %s2043_s0  ;;  %v555_v47 = vld [vmem:[%s3241_s2] sm:$0xff] }
 0x167   :  { %599 = vrot.lane.b32.xlu0 %v531_v31, %s2043_s0 }
 0x16f   :  { %342 = vrot.lane.b32.xlu0 %v171_v17, %s2048_s27 }
 0x175   :  { %v624_v40 = vpop.permute.xlu1 %623  ;;  %v622_v15 = vpop.permute.xlu0 %621 }
 0x176   :  { %v658_v31 = vsel %vm323_vm5, %v622_v15, %v624_v40  ;;  %v659_v17 = vsel %vm323_vm5, %v624_v40, %v626_v2 }
 0x177   :  { %617 = vrot.lane.b32.xlu0 %v2407_v13, %s2043_s0 }
 0x17d   :  { %v2549_v59 = vpop.permute.xlu2 %601 }
 0x185   :  { %v642_v50 = vpop.permute.xlu2 %641 }
 0x188   :  { %v2553_v51 = vpop.permute.xlu1 %619 }
 0x192   :  { %v632_v3 = vpop.permute.xlu2 %631 }
 0x19a   :  { %v640_v48 = vpop.permute.xlu2 %639 }
 0x19b   :  { %v665_v16 = vsel %vm323_vm5, %v640_v48, %v642_v50 }
 0x19c   :  { %v693_v36 = vsel %vm688_vm13, %v665_v16, 0 }
 0x19d   :  { %718 = vmatpush.bf16.msra.mxu1 %v693_v36 }
 0x1a5   :  { %v614_v13 = vpop.permute.xlu2 %613 }
 0x1ad   :  { %v646_v62 = vpop.permute.xlu1 %645  ;;  %v2559_v1 = vpop.permute.xlu2 %609 }
 0x1b1   :  { %v616_v9 = vpop.permute.xlu0 %615 }
 0x1b5   :  { %v636_v60 = vpop.permute.xlu1 %635 }
 0x1b9   :  { %v644_v5 = vpop.permute.xlu0 %643 }
 0x1ba   :  { %v666_v20 = vsel %vm323_vm5, %v642_v50, %v644_v5  ;;  %v667_v54 = vsel %vm323_vm5, %v644_v5, %v646_v62  ;;  %v2056_v50 = vmov 0   ;;  %v655_v5 = vsel %vm323_vm5, %v614_v13, %v616_v9 }
 0x1bb   :  { %v696_v0 = vsel %vm688_vm13, %v666_v20, 0  ;;  %v699_v18 = vsel %vm688_vm13, %v667_v54, 0  ;;  %1912 = vset.pattern.permute.xlu0 %v2056_v50  ;;  %1988 = vset.pattern.permute.xlu1 %v2056_v50 }
 0x1bc   :  { %732 = vmatpush.bf16.msra.mxu2 %v696_v0  ;;  %746 = vmatpush.bf16.msra.mxu3 %v699_v18 }
 0x1bd   :  { %v612_v38 = vpop.permute.xlu1 %611  ;;  %559 = vperm.xlu0 %1912, %v555_v47  }
 0x1be   :  { %v654_v62 = vsel %vm323_vm5, %v612_v38, %v614_v13  ;;  %v653_v9 = vsel %vm323_vm5, %v2559_v1, %v612_v38 }
 0x1c1   :  { %v634_v22 = vpop.permute.xlu0 %633 }
 0x1c2   :  { %v662_v25 = vsel %vm323_vm5, %v632_v3, %v634_v22  ;;  %v663_v55 = vsel %vm323_vm5, %v634_v22, %v636_v60  ;;  %v392_v60 = vpop.permute.xlu2 %391 }
 0x1c3   :  { %733 = vmatpush.bf16.msra.mxu2 %v662_v25  ;;  %747 = vmatpush.bf16.msra.mxu3 %v663_v55  ;;  %v401_v2 = vsel %vm162_vm3, %v392_v60, %v1861_v27  ;;  %v145_v55 = vmul.f32 %v2438_v8, %v2503_v10 }
 0x1c5   :  { %v606_v45 = vpop.permute.xlu1 %605 }
 0x1c7   :  { %734 = vmatpush.bf16.msra.mxu2 %v658_v31  ;;  %748 = vmatpush.bf16.msra.mxu3 %v659_v17 }
 0x1c9   :  { %v630_v16 = vpop.permute.xlu0 %629 }
 0x1ca   :  { %v661_v36 = vsel %vm323_vm5, %v630_v16, %v632_v3  ;;  %v657_v3 = vsel %vm323_vm5, %v2553_v51, %v622_v15  ;;  %v628_v38 = vpop.permute.xlu2 %627 }
 0x1cb   :  { %719 = vmatpush.bf16.msra.mxu1 %v661_v36  ;;  %735 = vmatpush.bf16.msra.mxu2 %v654_v62  ;;  %v660_v25 = vsel %vm323_vm5, %v628_v38, %v630_v16 }
 0x1cc   :  { %749 = vmatpush.bf16.msra.mxu3 %v655_v5 }
 0x1cd   :  { %v367_v20 = vpop.permute.xlu1 %366 }
 0x1ce   :  { %v377_v40 = vsel %vm376_vm12, %v367_v20, %v1911_v11 }
 0x1cf   :  { %v535_v54 = vpack.c.bf16 %v401_v2, %v377_v40  ;;  %720 = vmatpush.bf16.msra.mxu1 %v657_v3  ;;  %v2611_v2 = vmul.f32 0.0, %v2243_v46  ;;  %v2617_v40 = vmul.f32 0.0, %v2317_v41 }
 0x1d1   :  { %v604_v0 = vpop.permute.xlu0 %603  ;;  %607 = vrot.lane.b32.xlu1 %v535_v54, %s2043_s0 }
 0x1d2   :  { %v650_v57 = vsel %vm323_vm5, %v2549_v59, %v604_v0  ;;  %v651_v27 = vsel %vm323_vm5, %v604_v0, %v606_v45 }
 0x1d3   :  { %721 = vmatpush.bf16.msra.mxu1 %v653_v9  ;;  %736 = vmatpush.bf16.msra.mxu2 %v650_v57 }
 0x1d4   :  { %750 = vmatpush.bf16.msra.mxu3 %v651_v27 }
 0x1d5   :  { %v638_v11 = vpop.permute.xlu1 %637 }
 0x1d6   :  { %1735 = vmatmul.msk.bf16.vlgmr.msra.gmra.mxu2 %vm684_vm14, %v1773_v39  ;;  %v664_v15 = vsel %vm323_vm5, %v638_v11, %v640_v48 }
 0x1d7   :  { %1736 = vmatmul.msk.bf16.vlgmr.msra.gmra.mxu3 %vm684_vm14, %v1773_v39  ;;  %v690_v13 = vsel %vm688_vm13, %v664_v15, 0 }
 0x1d8   :  { %704 = vmatpush.bf16.msra.mxu0 %v690_v13 }
 0x1d9   :  { %v600_v18 = vpop.permute.xlu0 %599 }
 0x1da   :  { %v649_v22 = vsel %vm323_vm5, %v600_v18, %v2549_v59 }
 0x1db   :  { %722 = vmatpush.bf16.msra.mxu1 %v649_v22 }
 0x1dc   :  { %705 = vmatpush.bf16.msra.mxu0 %v660_v25 }
 0x1de   :  { %1734 = vmatmul.msk.bf16.vlgmr.msra.gmra.mxu1 %vm684_vm14, %v1773_v39 }
 0x1e1   :  { %v343_v48 = vpop.permute.xlu0 %342 }
 0x1e2   :  { %v352_v45 = vsel %vm214_vm2, %v343_v48, %v1891_v35 }
 0x1e3   :  { %v530_v47 = vpack.c.bf16 %v352_v45, %v145_v55 }
 0x1e5   :  { %597 = vrot.lane.b32.xlu2 %v530_v47, %s2043_s0 }
 0x1e9   :  { %v618_v31 = vpop.permute.xlu0 %617 }
 0x1ea   :  { %v656_v59 = vsel %vm323_vm5, %v618_v31, %v2553_v51 }
 0x1eb   :  { %706 = vmatpush.bf16.msra.mxu0 %v656_v59  ;;  %v3282_v59 = vld [vmem:[#allocation15_spill] sm:$0xff] }
 0x22f   :  { %v560_v35 = vpop.permute.xlu0 %559 }
 0x23f   :  { %v598_v16 = vpop.permute.xlu2 %597 }
 0x240   :  { %v648_v10 = vsel %vm323_vm5, %v598_v16, %v600_v18  ;;  %v817_v18 = vmul.f32 0.0, %v2198_v19 }
 0x243   :  { %v608_v17 = vpop.permute.xlu1 %607 }
 0x244   :  { %v652_v50 = vsel %vm323_vm5, %v608_v17, %v2559_v1  ;;  %v2614_v1 = vmul.f32 0.0, %v2319_v42 }
 0x245   :  { %707 = vmatpush.bf16.msra.mxu0 %v652_v50 }
 0x249   :  { %708 = vmatpush.bf16.msra.mxu0 %v648_v10 }
 0x24c   :  { %1733 = vmatmul.msk.bf16.vlgmr.msra.gmra.mxu0 %vm684_vm14, %v1773_v39 }
 0x259   :  { %v738_v62 = vpop.f32.mrf.mxu2 }
 0x25a   :  { %v739_v51 = vadd.f32 %v738_v62, %v560_v35  ;;  %v752_v9 = vpop.f32.mrf.mxu3 }
 0x25b   :  { %v724_v23 = vpop.f32.mrf.mxu1 }
 0x25c   :  { %v725_v5 = vadd.f32 %v724_v23, %v560_v35 }
 0x25e   :  { %v2625_v57 = vmax.f32 %v725_v5, 0.0 }
 0x260   :  { %v809_v13 = vmul.f32 %v2625_v57, %v2267_v7  ;;  %v785_v7 = vmul.f32 %v2625_v57, %v2373_v32 }
 0x2c9   :  { %v710_v36 = vpop.f32.mrf.mxu0 }
 0x2ca   :  { %v711_v60 = vadd.f32 %v710_v36, %v560_v35  ;;  %v3285_v36 = vld [vmem:[#allocation13_spill] sm:$0xff] }
 0x2cc   :  { %v2608_v20 = vmax.f32 %v711_v60, 0.0  ;;  %v3286_v60 = vld [vmem:[#allocation18_spill] sm:$0xff] }
 0x2cd   :  { %v780_v5 = vmul.f32 %v2625_v57, %v3286_v60 }
 0x2ce   :  { %v813_v3 = vmul.f32 %v2608_v20, %v2179_v6  ;;  %v808_v54 = vmul.f32 %v2174_v4, %v2608_v20  ;;  %v803_v0 = vmul.f32 %v2608_v20, %v2157_v58  ;;  %v2629_v46 = vmul.f32 %v2608_v20, %v2256_v52 }
 0x2cf   :  { %v2633_v41 = vmul.f32 %v2608_v20, %v2332_v56  ;;  %v2637_v6 = vmul.f32 %v2608_v20, %v2328_v49  ;;  %v2641_v58 = vmax.f32 %v739_v51, 0.0  ;;  %v753_v56 = vadd.f32 %v752_v9, %v560_v35  ;;  %v3287_v51 = vld [vmem:[#allocation19_spill] sm:$0xff] }
 0x2d0   :  { %987 = vrot.lane.b32.xlu0 %v813_v3, %s2054_s8  ;;  %963 = vrot.lane.b32.xlu2 %v808_v54, %s2051_s30  ;;  %v1978_v4 = vpack.i.bf16 %v2629_v46, %v2611_v2  ;;  %v814_v49 = vmul.f32 %v2625_v57, %v2338_v61  ;;  %v3288_v54 = vld [vmem:[#allocation17_spill] sm:$0xff] }
 0x2d1   :  { %939 = vrot.lane.b32.xlu1 %v803_v0, %s2053_s7  ;;  %v1983_v52 = vpack.i.bf16 %v2633_v41, %v2614_v1  ;;  %v1973_v42 = vpack.i.bf16 %v2637_v6, %v2617_v40  ;;  %v815_v27 = vmul.f32 %v2641_v58, %v2343_v63  ;;  %v2654_v39 = vmax.f32 %v753_v56, 0.0  ;;  %v3289_v56 = vld [vmem:[#allocation11_spill] sm:$0xff]  ;;  %v3290_v41 = vld [vmem:[#allocation20_spill] sm:$0xff] }
 0x2d2   :  { %v1913_v11 = vpack.i.bf16 %v2641_v58, %v2625_v57  ;;  %v804_v63 = vmul.f32 %v2625_v57, %v2298_v29  ;;  %v810_v38 = vmul.f32 %v2641_v58, %v2270_v12  ;;  %v805_v22 = vmul.f32 %v2641_v58, %v2285_v28 }
 0x2d3   :  { %v1918_v15 = vpack.i.bf16 %v815_v27, %v814_v49  ;;  %v816_v61 = vmul.f32 %v2654_v39, %v2305_v34  ;;  %v806_v19 = vmul.f32 %v2654_v39, %v2363_v24  ;;  %v811_v12 = vmul.f32 %v2654_v39, %v2231_v37  ;;  %v3280_v37 = vld [vmem:[#allocation10_spill] sm:$0xff] }
 0x2d4   :  { %v1938_v25 = vpack.i.bf16 %v810_v38, %v809_v13  ;;  %v1928_v48 = vpack.i.bf16 %v805_v22, %v804_v63  ;;  %v807_v28 = vmul.f32 0.0, %v2202_v21  ;;  %v786_v29 = vmul.f32 %v2641_v58, %v2368_v30  ;;  %v3281_v30 = vld [vmem:[#allocation12_spill] sm:$0xff] }
 0x2d5   :  { %v1923_v55 = vpack.i.bf16 %v817_v18, %v816_v61  ;;  %v812_v34 = vmul.f32 0.0, %v2222_v33  ;;  %v801_v24 = vmul.f32 %v2654_v39, %v2189_v14  ;;  %v799_v21 = vmul.f32 %v2625_v57, %v2208_v26  ;;  %v3283_v14 = vld [vmem:[#allocation14_spill] sm:$0xff]  ;;  %v3284_v26 = vld [vmem:[#allocation16_spill] sm:$0xff] }
 0x2d6   :  { %v1958_v45 = vpack.i.bf16 %v786_v29, %v785_v7  ;;  %v1933_v47 = vpack.i.bf16 %v807_v28, %v806_v19  ;;  %v802_v32 = vmul.f32 0.0, %v3280_v37  ;;  %v800_v33 = vmul.f32 %v2641_v58, %v3281_v30 }
 0x2d7   :  { %v1943_v31 = vpack.i.bf16 %v812_v34, %v811_v12  ;;  %v792_v17 = vmul.f32 %v3282_v59, %v2654_v39  ;;  %v790_v10 = vmul.f32 %v2625_v57, %v3283_v14  ;;  %v791_v23 = vmul.f32 %v2641_v58, %v3284_v26 }
 0x2d8   :  { %900 = vrot.lane.b32.xlu0 %v2654_v39, %s2050_s29  ;;  %1914 = vrot.lane.b32.xlu2 %v1913_v11, %s2050_s29  ;;  %v1953_v50 = vpack.i.bf16 %v802_v32, %v801_v24  ;;  %v1948_v16 = vpack.i.bf16 %v800_v33, %v799_v21  ;;  %v787_v62 = vmul.f32 %v2654_v39, %v3285_v36 }
 0x2d9   :  { %1919 = vrot.lane.b32.xlu1 %v1918_v15, %s2054_s8  ;;  %v1963_v35 = vpack.i.bf16 %v791_v23, %v790_v10  ;;  %v781_v3 = vmul.f32 %v2641_v58, %v3287_v51  ;;  %v782_v0 = vmul.f32 %v3288_v54, %v2654_v39  ;;  %v798_v49 = vmul.f32 %v3289_v56, %v2608_v20 }
 0x2db   :  { %v1968_v9 = vpack.i.bf16 %v781_v3, %v780_v5 }
 0x2e0   :  { %1939 = vrot.lane.b32.xlu0 %v1938_v25, %s2051_s30  ;;  %1924 = vrot.lane.b32.xlu2 %v1923_v55, %s2054_s8 }
 0x2e1   :  { %1929 = vrot.lane.b32.xlu1 %v1928_v48, %s2053_s7 }
 0x2e8   :  { %1959 = vrot.lane.b32.xlu0 %v1958_v45, %s2055_s9  ;;  %1934 = vrot.lane.b32.xlu2 %v1933_v47, %s2053_s7 }
 0x2e9   :  { %1944 = vrot.lane.b32.xlu1 %v1943_v31, %s2051_s30 }
 0x2f0   :  { %879 = vrot.lane.b32.xlu0 %v792_v17, %s2049_s28  ;;  %1954 = vrot.lane.b32.xlu2 %v1953_v50, %s2052_s6 }
 0x2f1   :  { %1949 = vrot.lane.b32.xlu1 %v1948_v16, %s2052_s6 }
 0x2f8   :  { %894 = vrot.lane.b32.xlu0 %v2608_v20, %s2050_s29  ;;  %1964 = vrot.lane.b32.xlu2 %v1963_v35, %s2049_s28 }
 0x2f9   :  { %855 = vrot.lane.b32.xlu1 %v787_v62, %s2055_s9 }
 0x300   :  { %831 = vrot.lane.b32.xlu2 %v782_v0, %s2048_s27 }
 0x301   :  { %1969 = vrot.lane.b32.xlu1 %v1968_v9, %s2048_s27 }
 0x309   :  { %915 = vrot.lane.b32.xlu1 %v798_v49, %s2052_s6 }
 0x32a   :  { %v2722_v27 = vpop.permute.xlu2 %963 }
 0x332   :  { %v2724_v11 = vpop.permute.xlu2 %1914 }
 0x333   :  { %v1917_v0 = vunpack.i.h.bf16 %v2724_v11  ;;  %v1916_v9 = vunpack.i.l.bf16 %v2724_v11 }
 0x33a   :  { %v2726_v15 = vpop.permute.xlu2 %1924 }
 0x33b   :  { %v1926_v25 = vunpack.i.l.bf16 %v2726_v15 }
 0x342   :  { %v2728_v13 = vpop.permute.xlu0 %987  ;;  %v2736_v38 = vpop.permute.xlu2 %1934 }
 0x343   :  { %v2730_v61 = vpop.permute.xlu1 %939  ;;  %v1936_v10 = vunpack.i.l.bf16 %v2736_v38 }
 0x344   :  { %v1021_v63 = vpack.c.bf16 %v2722_v27, %v2730_v61 }
 0x34a   :  { %v2734_v18 = vpop.permute.xlu0 %900  ;;  %v2751_v21 = vpop.permute.xlu2 %1954 }
 0x34b   :  { %v2738_v22 = vpop.permute.xlu1 %1919  ;;  %v1957_v50 = vunpack.i.h.bf16 %v2751_v21  ;;  %v1956_v16 = vunpack.i.l.bf16 %v2751_v21 }
 0x34c   :  { %v1922_v55 = vunpack.i.h.bf16 %v2738_v22  ;;  %v1921_v48 = vunpack.i.l.bf16 %v2738_v22 }
 0x34d   :  { %v928_v23 = vsel %vm445_vm8, %v1956_v16, %v1957_v50 }
 0x34e   :  { %v998_v7 = vsel %vm520_vm9, %v1921_v48, %v1922_v55  ;;  %v999_v19 = vsel %vm520_vm9, %v1922_v55, %v1926_v25  ;;  %v1020_v5 = vpack.c.bf16 %v928_v23, %v2734_v18 }
 0x34f   :  { %v1028_v12 = vpack.c.bf16 %v998_v7, %v998_v7  ;;  %v1029_v28 = vpack.c.bf16 %v999_v19, %v999_v19 }
 0x351   :  { %1106 = vrot.lane.b32.xlu0 %v1028_v12, %s2043_s0  ;;  %1108 = vrot.lane.b32.xlu1 %v1029_v28, %s2043_s0 }
 0x352   :  { %v1940_v29 = vpop.permute.xlu0 %1939  ;;  %v2774_v60 = vpop.permute.xlu2 %1964 }
 0x353   :  { %v1942_v34 = vunpack.i.h.bf16 %v1940_v29  ;;  %v1941_v45 = vunpack.i.l.bf16 %v1940_v29  ;;  %v1930_v47 = vpop.permute.xlu1 %1929  ;;  %v1967_v56 = vunpack.i.h.bf16 %v2774_v60  ;;  %v1966_v49 = vunpack.i.l.bf16 %v2774_v60 }
 0x354   :  { %v1932_v31 = vunpack.i.h.bf16 %v1930_v47  ;;  %v1931_v24 = vunpack.i.l.bf16 %v1930_v47  ;;  %v903_v29 = vsel %vm136_vm7, %v1916_v9, %v1917_v0 }
 0x355   :  { %v974_v37 = vsel %vm495_vm11, %v1941_v45, %v1942_v34  ;;  %v2756_v32 = vsel %vm495_vm11, %v2722_v27, %v1941_v45  ;;  %v883_v28 = vsel %vm162_vm3, %v1966_v49, %v1967_v56 }
 0x356   :  { %v950_v30 = vsel %vm470_vm10, %v1931_v24, %v1932_v31  ;;  %v2761_v33 = vsel %vm470_vm10, %v2730_v61, %v1931_v24  ;;  %v951_v36 = vsel %vm470_vm10, %v1932_v31, %v1936_v10 }
 0x357   :  { %v1023_v59 = vpack.c.bf16 %v974_v37, %v950_v30  ;;  %v1022_v17 = vpack.c.bf16 %v2756_v32, %v2761_v33  ;;  %v1927_v37 = vunpack.i.h.bf16 %v2726_v15  ;;  %v1937_v15 = vunpack.i.h.bf16 %v2736_v38 }
 0x359   :  { %1096 = vrot.lane.b32.xlu0 %v1023_v59, %s2043_s0  ;;  %v1000_v50 = vsel %vm520_vm9, %v1926_v25, %v1927_v37 }
 0x35a   :  { %v2770_v35 = vpop.permute.xlu0 %1959 }
 0x35b   :  { %v1945_v14 = vpop.permute.xlu1 %1944  ;;  %v1962_v3 = vunpack.i.h.bf16 %v2770_v35  ;;  %v1961_v54 = vunpack.i.l.bf16 %v2770_v35 }
 0x35c   :  { %v1946_v26 = vunpack.i.l.bf16 %v1945_v14 }
 0x35d   :  { %v859_v12 = vsel %vm376_vm12, %v1961_v54, %v1962_v3 }
 0x35e   :  { %v975_v62 = vsel %vm495_vm11, %v1942_v34, %v1946_v26  ;;  %v1013_v11 = vpack.c.bf16 %v883_v28, %v859_v12 }
 0x35f   :  { %v1024_v51 = vpack.c.bf16 %v975_v62, %v951_v36  ;;  %v832_v36 = vpop.permute.xlu2 %831 }
 0x361   :  { %1090 = vrot.lane.b32.xlu0 %v1020_v5, %s2043_s0  ;;  %1098 = vrot.lane.b32.xlu1 %v1024_v51, %s2043_s0  ;;  %v1030_v5 = vpack.c.bf16 %v1000_v50, %v1000_v50  ;;  %v777_v51 = vmul.f32 %v2654_v39, %v2389_v44  ;;  %v952_v44 = vsel %vm470_vm10, %v1936_v10, %v1937_v15 }
 0x362   :  { %v880_v47 = vpop.permute.xlu0 %879 }
 0x363   :  { %v1950_v55 = vpop.permute.xlu1 %1949  ;;  %v884_v30 = vsel %vm162_vm3, %v1967_v56, %v880_v47  ;;  %v776_v56 = vmul.f32 %v2641_v58, %v2509_v43  ;;  %v1010_v25 = vpack.c.bf16 %v832_v36, %v777_v51  ;;  %v904_v58 = vsel %vm136_vm7, %v1917_v0, %v2734_v18 }
 0x364   :  { %v1952_v7 = vunpack.i.h.bf16 %v1950_v55  ;;  %v1951_v19 = vunpack.i.l.bf16 %v1950_v55 }
 0x366   :  { %v926_v34 = vsel %vm445_vm8, %v1951_v19, %v1952_v7  ;;  %v927_v43 = vsel %vm445_vm8, %v1952_v7, %v1956_v16 }
 0x367   :  { %v1018_v45 = vpack.c.bf16 %v926_v34, %v903_v29  ;;  %v1019_v38 = vpack.c.bf16 %v927_v43, %v904_v58 }
 0x369   :  { %1076 = vrot.lane.b32.xlu0 %v1013_v11, %s2043_s0  ;;  %1086 = vrot.lane.b32.xlu1 %v1018_v45, %s2043_s0 }
 0x36b   :  { %v856_v31 = vpop.permute.xlu1 %855 }
 0x36c   :  { %v860_v24 = vsel %vm376_vm12, %v1962_v3, %v856_v31  ;;  %v1015_v21 = vpack.c.bf16 %v880_v47, %v856_v31  ;;  %v1947_v3 = vunpack.i.h.bf16 %v1945_v14  ;;  %v997_v14 = vsel %vm520_vm9, %v2728_v13, %v1921_v48 }
 0x36d   :  { %v1014_v59 = vpack.c.bf16 %v884_v30, %v860_v24  ;;  %v1027_v2 = vpack.c.bf16 %v997_v14, %v997_v14 }
 0x36e   :  { %1080 = vrot.lane.b32.xlu2 %v1015_v21, %s2043_s0  ;;  %v976_v28 = vsel %vm495_vm11, %v1946_v26, %v1947_v3 }
 0x36f   :  { %v1025_v39 = vpack.c.bf16 %v976_v28, %v952_v44  ;;  %v773_v44 = vmul.f32 0.0, %v2438_v8 }
 0x371   :  { %1078 = vrot.lane.b32.xlu1 %v1014_v59, %s2043_s0 }
 0x373   :  { %v2803_v23 = vpop.permute.xlu1 %1969 }
 0x374   :  { %v1972_v62 = vunpack.i.h.bf16 %v2803_v23  ;;  %v1971_v10 = vunpack.i.l.bf16 %v2803_v23 }
 0x376   :  { %1110 = vrot.lane.b32.xlu2 %v1030_v5, %s2043_s0  ;;  %v836_v55 = vsel %vm214_vm2, %v1972_v62, %v832_v36  ;;  %v835_v1 = vsel %vm214_vm2, %v1971_v10, %v1972_v62  ;;  %v2891_v62 = vld [vmem:[%s3242_s3] sm:$0xf] }
 0x377   :  { %v1009_v12 = vpack.c.bf16 %v836_v55, %v776_v56 }
 0x379   :  { %1068 = vrot.lane.b32.xlu0 %v1009_v12, %s2043_s0  ;;  %1070 = vrot.lane.b32.xlu1 %v1010_v25, %s2043_s0 }
 0x37b   :  { %v916_v46 = vpop.permute.xlu1 %915 }
 0x37c   :  { %v925_v18 = vsel %vm445_vm8, %v916_v46, %v1951_v19 }
 0x37e   :  { %1100 = vrot.lane.b32.xlu2 %v1025_v39, %s2043_s0 }
 0x381   :  { %1979 = vrot.lane.b32.xlu0 %v1978_v4, %s2049_s28  ;;  %1984 = vrot.lane.b32.xlu1 %v1983_v52, %s2048_s27  ;;  %v775_v4 = vmul.f32 %v2625_v57, %v3290_v41  ;;  %v895_v52 = vpop.permute.xlu0 %894  ;;  %v1026_v57 = vpack.c.bf16 %v2728_v13, %v2728_v13 }
 0x382   :  { %v902_v48 = vsel %vm136_vm7, %v895_v52, %v1916_v9  ;;  %v1016_v16 = vpack.c.bf16 %v916_v46, %v895_v52 }
 0x383   :  { %v1008_v22 = vpack.c.bf16 %v835_v1, %v775_v4  ;;  %v1017_v26 = vpack.c.bf16 %v925_v18, %v902_v48  ;;  %v774_v18 = vmul.f32 %v2608_v20, %v2527_v53  ;;  %v1031_v48 = vld [vmem:[%s3243_s4] sm:$0xff]  ;;  %s2058_s4 = smov [#allocation6]  }
 0x384   :  { %s1701_s18 = sshll.u32 %s2058_s4, 4  ;;  %s1702_s18 = int_to_ptr.vmem [resolvable:$true] %s1701_s18 }
 0x386   :  { %1088 = vrot.lane.b32.xlu2 %v1019_v38, %s2043_s0 }
 0x389   :  { %1104 = vrot.lane.b32.xlu0 %v1027_v2, %s2043_s0  ;;  %1092 = vrot.lane.b32.xlu1 %v1021_v63, %s2043_s0 }
 0x38e   :  { %1066 = vrot.lane.b32.xlu2 %v1008_v22, %s2043_s0  ;;  %v556_v22 = vld [vmem:[%s3241_s2 + $0x8] sm:$0xff]  ;;  %s2057_s2 = smov 64  }
 0x391   :  { %1082 = vrot.lane.b32.xlu0 %v1016_v16, %s2043_s0  ;;  %1084 = vrot.lane.b32.xlu1 %v1017_v26, %s2043_s0 }
 0x396   :  { %1974 = vrot.lane.b32.xlu2 %v1973_v42, %s2055_s9 }
 0x39e   :  { %1102 = vrot.lane.b32.xlu2 %v1026_v57, %s2043_s0 }
 0x3a6   :  { %1094 = vrot.lane.b32.xlu2 %v1022_v17, %s2043_s0 }
 0x3c3   :  { %v2861_v27 = vpop.permute.xlu0 %1106  ;;  %v1109_v61 = vpop.permute.xlu1 %1108 }
 0x3c4   :  { %v1130_v63 = vsel %vm323_vm5, %v2861_v27, %v1109_v61 }
 0x3c5   :  { %v1158_v0 = vsel %vm688_vm13, %v1130_v63, 0 }
 0x3c6   :  { %1192 = vmatpush.bf16.msrb.mxu2 %v1158_v0 }
 0x3c8   :  { %v1081_v40 = vpop.permute.xlu2 %1080 }
 0x3cb   :  { %v2866_v6 = vpop.permute.xlu0 %1096 }
 0x3d0   :  { %v1111_v42 = vpop.permute.xlu2 %1110 }
 0x3d1   :  { %v1131_v13 = vsel %vm323_vm5, %v1109_v61, %v1111_v42  ;;  %v3291_v61 = vlaneseq }
 0x3d2   :  { %v1161_v9 = vsel %vm688_vm13, %v1131_v13, 0  ;;  %v3292_v13 = vld [vmem:[#allocation9_spill] sm:$0xff] }
 0x3d3   :  { %1205 = vmatpush.bf16.msrb.mxu3 %v1161_v9  ;;  %v1099_v32 = vpop.permute.xlu1 %1098  ;;  %v1091_v7 = vpop.permute.xlu0 %1090  ;;  %v2934_v63 = vshrl.u32 %v3291_v61, 7  ;;  %v2941_v9 = vshra.s32 %v3292_v13, 3 }
 0x3d4   :  { %v1126_v33 = vsel %vm323_vm5, %v2866_v6, %v1099_v32 }
 0x3d5   :  { %1193 = vmatpush.bf16.msrb.mxu2 %v1126_v33  ;;  %v1235_v0 = vadd.s32 120, %v2934_v63  ;;  %v1250_v42 = vadd.s32 240, %v2934_v63 }
 0x3d7   :  { %v1267_v33 = vshra.s32 %v1235_v0, 4 }
 0x3d8   :  { %v1101_v17 = vpop.permute.xlu2 %1100 }
 0x3d9   :  { %v1127_v19 = vsel %vm323_vm5, %v1099_v32, %v1101_v17  ;;  %v2944_v32 = vand.u32 7, %v3292_v13  ;;  %v1331_v17 = vand.u32 15, %v1235_v0  ;;  %v1247_v0 = vadd.s32 216, %v2934_v63 }
 0x3da   :  { %1206 = vmatpush.bf16.msrb.mxu3 %v1127_v19 }
 0x3db   :  { %v2873_v29 = vpop.permute.xlu1 %1086  ;;  %v2878_v47 = vpop.permute.xlu0 %1076 }
 0x3e0   :  { %v1089_v34 = vpop.permute.xlu2 %1088 }
 0x3e1   :  { %v1122_v11 = vsel %vm323_vm5, %v2873_v29, %v1089_v34  ;;  %v1123_v45 = vsel %vm323_vm5, %v1089_v34, %v1091_v7 }
 0x3e2   :  { %1194 = vmatpush.bf16.msrb.mxu2 %v1122_v11  ;;  %1207 = vmatpush.bf16.msrb.mxu3 %v1123_v45  ;;  %v1282_v11 = vshra.s32 %v1250_v42, 4  ;;  %v1346_v45 = vand.u32 15, %v1250_v42 }
 0x3e3   :  { %v1079_v31 = vpop.permute.xlu1 %1078 }
 0x3e4   :  { %v1118_v24 = vsel %vm323_vm5, %v2878_v47, %v1079_v31  ;;  %v1119_v21 = vsel %vm323_vm5, %v1079_v31, %v1081_v40  ;;  %v1251_v40 = vadd.s32 248, %v2934_v63  ;;  %v1299_v31 = vand.u32 15, %v1267_v33 }
 0x3e6   :  { %1195 = vmatpush.bf16.msrb.mxu2 %v1118_v24  ;;  %1208 = vmatpush.bf16.msrb.mxu3 %v1119_v21  ;;  %v1283_v7 = vshra.s32 %v1251_v40, 4  ;;  %v1347_v19 = vand.u32 15, %v1251_v40  ;;  %v1429_v24 = vshra.s32 %v1331_v17, 1 }
 0x3e8   :  { %v2883_v37 = vpop.permute.xlu2 %1066  ;;  %v1315_v21 = vand.u32 15, %v1283_v7  ;;  %vm1461_vm15 = vcmp.eq.s32.totalorder %v1429_v24, %v2944_v32 }
 0x3eb   :  { %v1069_v30 = vpop.permute.xlu0 %1068  ;;  %v1071_v59 = vpop.permute.xlu1 %1070 }
 0x3ec   :  { %v1114_v50 = vsel %vm323_vm5, %v2883_v37, %v1069_v30  ;;  %v1115_v36 = vsel %vm323_vm5, %v1069_v30, %v1071_v59  ;;  %v1445_v30 = vshra.s32 %v1347_v19, 1 }
 0x3ed   :  { %1196 = vmatpush.bf16.msrb.mxu2 %v1114_v50  ;;  %1209 = vmatpush.bf16.msrb.mxu3 %v1115_v36  ;;  %v1314_v36 = vand.u32 15, %v1282_v11  ;;  %v1279_v11 = vshra.s32 %v1247_v0, 4 }
 0x3ee   :  { %vm1477_vm0 = vcmp.eq.s32.totalorder %v1445_v30, %v2944_v32  ;;  %v1230_v30 = vadd.s32 80, %v2934_v63 }
 0x3f0   :  { %1739 = vmatmul.msk.bf16.vlgmr.msrb.gmra.mxu2 %vm684_vm14, %v2891_v62  ;;  %1740 = vmatmul.msk.bf16.vlgmr.msrb.gmra.mxu3 %vm684_vm14, %v2891_v62  ;;  %v1975_v5 = vpop.permute.xlu2 %1974 }
 0x3f1   :  { %v1977_v51 = vunpack.i.h.bf16 %v1975_v5  ;;  %v1976_v3 = vunpack.i.l.bf16 %v1975_v5  ;;  %v1444_v5 = vshra.s32 %v1346_v45, 1  ;;  %v1343_v45 = vand.u32 15, %v1247_v0 }
 0x3f3   :  { %v1980_v56 = vpop.permute.xlu0 %1979  ;;  %v1985_v55 = vpop.permute.xlu1 %1984  ;;  %v858_v39 = vsel %vm376_vm12, %v1977_v51, %v1961_v54  ;;  %v857_v58 = vsel %vm376_vm12, %v1976_v3, %v1977_v51  ;;  %v1365_v51 = vshra.s32 %v1299_v31, 1  ;;  %v1381_v3 = vshra.s32 %v1315_v21, 1 }
 0x3f4   :  { %v1982_v15 = vunpack.i.h.bf16 %v1980_v56  ;;  %v1981_v25 = vunpack.i.l.bf16 %v1980_v56  ;;  %v1987_v12 = vunpack.i.h.bf16 %v1985_v55  ;;  %v1986_v28 = vunpack.i.l.bf16 %v1985_v55 }
 0x3f5   :  { %v1380_v55 = vshra.s32 %v1314_v36, 1  ;;  %vm1413_vm4 = vcmp.eq.s32.totalorder %v1381_v3, %v2941_v9  ;;  %v1441_v36 = vshra.s32 %v1343_v45, 1  ;;  %v1262_v3 = vshra.s32 %v1230_v30, 4 }
 0x3f6   :  { %v882_v43 = vsel %vm162_vm3, %v1982_v15, %v1966_v49  ;;  %v881_v38 = vsel %vm162_vm3, %v1981_v25, %v1982_v15  ;;  %v833_v14 = vsel %vm214_vm2, %v1986_v28, %v1987_v12  ;;  %v834_v49 = vsel %vm214_vm2, %v1987_v12, %v1971_v10  ;;  %vm1509_vm9 = vmand %vm1413_vm4, %vm1477_vm0 }
 0x3f7   :  { %v1012_v2 = vpack.c.bf16 %v882_v43, %v858_v39  ;;  %v1011_v46 = vpack.c.bf16 %v881_v38, %v857_v58  ;;  %v1006_v1 = vpack.c.bf16 %v833_v14, %v773_v44  ;;  %v1007_v23 = vpack.c.bf16 %v834_v49, %v774_v18 }
 0x3f8   :  { %v1103_v41 = vpop.permute.xlu2 %1102  ;;  %vm1476_vm2 = vcmp.eq.s32.totalorder %v1444_v5, %v2944_v32  ;;  %vm1397_vm3 = vcmp.eq.s32.totalorder %v1365_v51, %v2941_v9  ;;  %v1233_v15 = vadd.s32 104, %v2934_v63  ;;  %v1249_v25 = vadd.s32 232, %v2934_v63 }
 0x3f9   :  { %1074 = vrot.lane.b32.xlu0 %v1012_v2, %s2043_s0  ;;  %1072 = vrot.lane.b32.xlu2 %v1011_v46, %s2043_s0  ;;  %vm1493_vm6 = vmand %vm1397_vm3, %vm1461_vm15  ;;  %vm2956_vm8 = vcmp.eq.s32.totalorder %v1380_v55, %v2941_v9  ;;  %v1232_v28 = vadd.s32 96, %v2934_v63  ;;  %v1248_v44 = vadd.s32 224, %v2934_v63  ;;  %v3295_v39 = vmov 0.0  }
 0x3fa   :  { %1062 = vrot.lane.b32.xlu1 %v1006_v1, %s2043_s0  ;;  %v1756_v43 = vsel %vm1493_vm6, 1.0, %v3295_v39  ;;  %v1265_v58 = vshra.s32 %v1233_v15, 4  ;;  %v1329_v38 = vand.u32 15, %v1233_v15  ;;  %v1281_v14 = vshra.s32 %v1249_v25, 4  ;;  %vm1508_vm11 = vmand %vm2956_vm8, %vm1476_vm2 }
 0x3fb   :  { %v1105_v8 = vpop.permute.xlu0 %1104  ;;  %v1093_v35 = vpop.permute.xlu1 %1092  ;;  %v2965_v2 = vmul.f32 0.25, %v1756_v43  ;;  %v1772_v46 = vsel %vm1509_vm9, 1.0, %v3295_v39  ;;  %v1345_v1 = vand.u32 15, %v1249_v25  ;;  %v1246_v5 = vadd.s32 208, %v2934_v63 }
 0x3fc   :  { %v1128_v60 = vsel %vm323_vm5, %v1103_v41, %v1105_v8  ;;  %v1129_v54 = vsel %vm323_vm5, %v1105_v8, %v2861_v27  ;;  %v1264_v41 = vshra.s32 %v1232_v28, 4  ;;  %v2970_v8 = vmul.f32 0.25, %v1772_v46 }
 0x3fd   :  { %v1152_v4 = vsel %vm688_vm13, %v1128_v60, 0  ;;  %v1155_v52 = vsel %vm688_vm13, %v1129_v54, 0  ;;  %v1297_v60 = vand.u32 15, %v1265_v58  ;;  %v1427_v54 = vshra.s32 %v1329_v38, 1  ;;  %1649 = vmatpush.msra.mxu2 %v2965_v2 }
 0x3fe   :  { %1166 = vmatpush.bf16.msrb.mxu0 %v1152_v4  ;;  %1179 = vmatpush.bf16.msrb.mxu1 %v1155_v52  ;;  %v1771_v4 = vsel %vm1508_vm11, 1.0, %v3295_v39  ;;  %v1313_v52 = vand.u32 15, %v1281_v14  ;;  %v1443_v18 = vshra.s32 %v1345_v1, 1  ;;  %v1326_v55 = vand.u32 15, %v1230_v30 }
 0x3ff   :  { %1669 = vmatpush.msra.mxu3 %v2970_v8  ;;  %vm1459_vm12 = vcmp.eq.s32.totalorder %v1427_v54, %v2944_v32  ;;  %v1278_v15 = vshra.s32 %v1246_v5, 4  ;;  %v1294_v12 = vand.u32 15, %v1262_v3  ;;  %v1245_v54 = vadd.s32 200, %v2934_v63 }
 0x400   :  { %v1095_v16 = vpop.permute.xlu2 %1094  ;;  %vm1475_vm13 = vcmp.eq.s32.totalorder %v1443_v18, %v2944_v32  ;;  %v1424_v58 = vshra.s32 %v1326_v55, 1  ;;  %v1243_v3 = vadd.s32 184, %v2934_v63 }
 0x401   :  { %564 = vperm.xlu0 %1912, %v556_v22   ;;  %1064 = vrot.lane.b32.xlu2 %v1007_v23, %s2043_s0  ;;  %v1124_v10 = vsel %vm323_vm5, %v1093_v35, %v1095_v16  ;;  %v1125_v53 = vsel %vm323_vm5, %v1095_v16, %v2866_v6  ;;  %v1234_v6 = vadd.s32 112, %v2934_v63  ;;  %v2982_v22 = vmul.f32 0.25, %v1771_v4 }
 0x402   :  { %1034 = vperm.xlu1 %1988, %v1031_v48   ;;  %1167 = vmatpush.bf16.msrb.mxu0 %v1124_v10  ;;  %v1363_v48 = vshra.s32 %v1297_v60, 1  ;;  %v1296_v23 = vand.u32 15, %v1264_v41  ;;  %v1379_v16 = vshra.s32 %v1313_v52, 1  ;;  %v1328_v10 = vand.u32 15, %v1232_v28 }
 0x403   :  { %1180 = vmatpush.bf16.msrb.mxu1 %v1125_v53  ;;  %v1083_v20 = vpop.permute.xlu0 %1082  ;;  %v1085_v26 = vpop.permute.xlu1 %1084  ;;  %v1330_v34 = vand.u32 15, %v1234_v6  ;;  %v1280_v53 = vshra.s32 %v1248_v44, 4  ;;  %1670 = vmatpush.msra.mxu3 %v2982_v22  ;;  %v1342_v28 = vand.u32 15, %v1246_v5  ;;  %v1310_v38 = vand.u32 15, %v1278_v15 }
 0x404   :  { %v1120_v57 = vsel %vm323_vm5, %v1083_v20, %v1085_v26  ;;  %v1121_v27 = vsel %vm323_vm5, %v1085_v26, %v2873_v29  ;;  %v1266_v29 = vshra.s32 %v1234_v6, 4  ;;  %vm1395_vm15 = vcmp.eq.s32.totalorder %v1363_v48, %v2941_v9 }
 0x405   :  { %v1428_v50 = vshra.s32 %v1330_v34, 1  ;;  %v1362_v20 = vshra.s32 %v1296_v23, 1  ;;  %v1344_v26 = vand.u32 15, %v1248_v44  ;;  %vm1491_vm0 = vmand %vm1395_vm15, %vm1459_vm12  ;;  %v1312_v61 = vand.u32 15, %v1280_v53 }
 0x406   :  { %1168 = vmatpush.bf16.msrb.mxu0 %v1120_v57  ;;  %v1298_v59 = vand.u32 15, %v1266_v29  ;;  %v1231_v57 = vadd.s32 88, %v2934_v63  ;;  %v1754_v40 = vsel %vm1491_vm0, 1.0, %v3295_v39  ;;  %v1229_v44 = vadd.s32 72, %v2934_v63 }
 0x407   :  { %1181 = vmatpush.bf16.msrb.mxu1 %v1121_v27  ;;  %vm1460_vm1 = vcmp.eq.s32.totalorder %v1428_v50, %v2944_v32  ;;  %v1426_v27 = vshra.s32 %v1328_v10, 1  ;;  %vm1394_vm3 = vcmp.eq.s32.totalorder %v1362_v20, %v2941_v9  ;;  %v1442_v6 = vshra.s32 %v1344_v26, 1 }
 0x408   :  { %v1364_v56 = vshra.s32 %v1298_v59, 1  ;;  %v1263_v42 = vshra.s32 %v1231_v57, 4  ;;  %v2994_v13 = vmul.f32 0.25, %v1754_v40  ;;  %v1378_v17 = vshra.s32 %v1312_v61, 1 }
 0x409   :  { %vm1458_vm4 = vcmp.eq.s32.totalorder %v1426_v27, %v2944_v32  ;;  %v1327_v29 = vand.u32 15, %v1231_v57  ;;  %v1311_v50 = vand.u32 15, %v1279_v11  ;;  %v1360_v14 = vshra.s32 %v1294_v12, 1 }
 0x40a   :  { %vm1396_vm7 = vcmp.eq.s32.totalorder %v1364_v56, %v2941_v9  ;;  %vm1490_vm6 = vmand %vm1394_vm3, %vm1458_vm4  ;;  %v1295_v19 = vand.u32 15, %v1263_v42  ;;  %vm1410_vm8 = vcmp.eq.s32.totalorder %v1378_v17, %v2941_v9  ;;  %v1440_v46 = vshra.s32 %v1342_v28, 1 }
 0x40b   :  { %vm1492_vm10 = vmand %vm1396_vm7, %vm1460_vm1  ;;  %vm1411_vm1 = vcmp.eq.s32.totalorder %v1379_v16, %v2941_v9  ;;  %vm1474_vm7 = vcmp.eq.s32.totalorder %v1442_v6, %v2944_v32  ;;  %v1753_v34 = vsel %vm1490_vm6, 1.0, %v3295_v39  ;;  %v1425_v21 = vshra.s32 %v1327_v29, 1 }
 0x40c   :  { %v1755_v35 = vsel %vm1492_vm10, 1.0, %v3295_v39  ;;  %vm1507_vm2 = vmand %vm1411_vm1, %vm1475_vm13  ;;  %v3005_v31 = vmul.f32 0.25, %v1753_v34  ;;  %v1361_v24 = vshra.s32 %v1295_v19, 1  ;;  %v1377_v56 = vshra.s32 %v1311_v50, 1 }
 0x40d   :  { %v2978_v49 = vmul.f32 0.25, %v1755_v35  ;;  %v1770_v33 = vsel %vm1507_vm2, 1.0, %v3295_v39  ;;  %vm1506_vm9 = vmand %vm1410_vm8, %vm1474_vm7  ;;  %vm1457_vm11 = vcmp.eq.s32.totalorder %v1425_v21, %v2944_v32  ;;  %vm1473_vm13 = vcmp.eq.s32.totalorder %v1441_v36, %v2944_v32 }
 0x40e   :  { %v2998_v7 = vmul.f32 0.25, %v1770_v33  ;;  %v1769_v59 = vsel %vm1506_vm9, 1.0, %v3295_v39  ;;  %vm1393_vm10 = vcmp.eq.s32.totalorder %v1361_v24, %v2941_v9  ;;  %vm1409_vm15 = vcmp.eq.s32.totalorder %v1377_v56, %v2941_v9 }
 0x40f   :  { %1650 = vmatpush.msra.mxu2 %v2978_v49  ;;  %v3011_v51 = vmul.f32 0.25, %v1769_v59  ;;  %vm1489_vm12 = vmand %vm1393_vm10, %vm1457_vm11  ;;  %v1261_v1 = vshra.s32 %v1229_v44, 4  ;;  %v1325_v41 = vand.u32 15, %v1229_v44  ;;  %vm1456_vm1 = vcmp.eq.s32.totalorder %v1424_v58, %v2944_v32 }
 0x410   :  { %1671 = vmatpush.msra.mxu3 %v2998_v7  ;;  %v1752_v25 = vsel %vm1489_vm12, 1.0, %v3295_v39  ;;  %vm1505_vm0 = vmand %vm1409_vm15, %vm1473_vm13  ;;  %v1376_v60 = vshra.s32 %v1310_v38, 1  ;;  %vm1392_vm2 = vcmp.eq.s32.totalorder %v1360_v14, %v2941_v9  ;;  %vm1472_vm3 = vcmp.eq.s32.totalorder %v1440_v46, %v2944_v32 }
 0x411   :  { %1651 = vmatpush.msra.mxu2 %v2994_v13  ;;  %v3019_v43 = vmul.f32 0.25, %v1752_v25  ;;  %v1768_v35 = vsel %vm1505_vm0, 1.0, %v3295_v39  ;;  %v1293_v52 = vand.u32 15, %v1261_v1  ;;  %vm1488_vm4 = vmand %vm1392_vm2, %vm1456_vm1  ;;  %v1423_v18 = vshra.s32 %v1325_v41, 1 }
 0x412   :  { %1672 = vmatpush.msra.mxu3 %v3011_v51  ;;  %v3026_v4 = vmul.f32 0.25, %v1768_v35  ;;  %vm1408_vm6 = vcmp.eq.s32.totalorder %v1376_v60, %v2941_v9  ;;  %v1277_v48 = vshra.s32 %v1245_v54, 4  ;;  %v1341_v23 = vand.u32 15, %v1245_v54 }
 0x413   :  { %1652 = vmatpush.msra.mxu2 %v3005_v31  ;;  %v1751_v16 = vsel %vm1488_vm4, 1.0, %v3295_v39  ;;  %vm1504_vm7 = vmand %vm1408_vm6, %vm1472_vm3  ;;  %v1359_v10 = vshra.s32 %v1293_v52, 1  ;;  %v1228_v53 = vadd.s32 64, %v2934_v63  ;;  %v1244_v20 = vadd.s32 192, %v2934_v63 }
 0x414   :  { %1673 = vmatpush.msra.mxu3 %v3026_v4  ;;  %v3035_v26 = vmul.f32 0.25, %v1751_v16  ;;  %v1767_v57 = vsel %vm1504_vm7, 1.0, %v3295_v39  ;;  %vm1455_vm8 = vcmp.eq.s32.totalorder %v1423_v18, %v2944_v32  ;;  %v1309_v27 = vand.u32 15, %v1277_v48 }
 0x415   :  { %1653 = vmatpush.msra.mxu2 %v3019_v43  ;;  %v3039_v61 = vmul.f32 0.25, %v1767_v57  ;;  %vm1391_vm9 = vcmp.eq.s32.totalorder %v1359_v10, %v2941_v9  ;;  %v1439_v0 = vshra.s32 %v1341_v23, 1  ;;  %v1260_v40 = vshra.s32 %v1228_v53, 4 }
 0x416   :  { %vm1487_vm10 = vmand %vm1391_vm9, %vm1455_vm8  ;;  %v1375_v6 = vshra.s32 %v1309_v27, 1  ;;  %v1324_v42 = vand.u32 15, %v1228_v53  ;;  %v1276_v33 = vshra.s32 %v1244_v20, 4  ;;  %v1340_v17 = vand.u32 15, %v1244_v20 }
 0x417   :  { %1654 = vmatpush.msra.mxu2 %v3035_v26  ;;  %1674 = vmatpush.msra.mxu3 %v3039_v61  ;;  %v1750_v19 = vsel %vm1487_vm10, 1.0, %v3295_v39  ;;  %vm1471_vm11 = vcmp.eq.s32.totalorder %v1439_v0, %v2944_v32  ;;  %v1292_v29 = vand.u32 15, %v1260_v40  ;;  %v1227_v34 = vadd.s32 56, %v2934_v63 }
 0x418   :  { %v3047_v11 = vmul.f32 0.25, %v1750_v19  ;;  %vm1407_vm12 = vcmp.eq.s32.totalorder %v1375_v6, %v2941_v9  ;;  %v1422_v45 = vshra.s32 %v1324_v42, 1  ;;  %v1308_v24 = vand.u32 15, %v1276_v33 }
 0x419   :  { %vm1503_vm13 = vmand %vm1407_vm12, %vm1471_vm11  ;;  %v1358_v21 = vshra.s32 %v1292_v29, 1  ;;  %v1438_v30 = vshra.s32 %v1340_v17, 1  ;;  %v1259_v59 = vshra.s32 %v1227_v34, 4  ;;  %v1323_v50 = vand.u32 15, %v1227_v34 }
 0x41a   :  { %1655 = vmatpush.msra.mxu2 %v3047_v11  ;;  %v1766_v36 = vsel %vm1503_vm13, 1.0, %v3295_v39  ;;  %vm1454_vm15 = vcmp.eq.s32.totalorder %v1422_v45, %v2944_v32  ;;  %v1374_v5 = vshra.s32 %v1308_v24, 1  ;;  %v1275_v25 = vshra.s32 %v1243_v3, 4 }
 0x41b   :  { %v3054_v56 = vmul.f32 0.25, %v1766_v36  ;;  %vm1390_vm0 = vcmp.eq.s32.totalorder %v1358_v21, %v2941_v9  ;;  %vm1470_vm1 = vcmp.eq.s32.totalorder %v1438_v30, %v2944_v32  ;;  %v1291_v55 = vand.u32 15, %v1259_v59 }
 0x41c   :  { %vm1486_vm2 = vmand %vm1390_vm0, %vm1454_vm15  ;;  %vm1406_vm3 = vcmp.eq.s32.totalorder %v1374_v5, %v2941_v9  ;;  %v1421_v15 = vshra.s32 %v1323_v50, 1  ;;  %v1339_v12 = vand.u32 15, %v1243_v3  ;;  %v1226_v58 = vadd.s32 48, %v2934_v63 }
 0x41d   :  { %1675 = vmatpush.msra.mxu3 %v3054_v56  ;;  %v1749_v28 = vsel %vm1486_vm2, 1.0, %v3295_v39  ;;  %vm1502_vm4 = vmand %vm1406_vm3, %vm1470_vm1  ;;  %v1357_v44 = vshra.s32 %v1291_v55, 1  ;;  %v1242_v38 = vadd.s32 176, %v2934_v63  ;;  %v1307_v41 = vand.u32 15, %v1275_v25 }
 0x41e   :  { %v3065_v46 = vmul.f32 0.25, %v1749_v28  ;;  %v1765_v1 = vsel %vm1502_vm4, 1.0, %v3295_v39  ;;  %vm1453_vm6 = vcmp.eq.s32.totalorder %v1421_v15, %v2944_v32  ;;  %v1437_v60 = vshra.s32 %v1339_v12, 1 }
 0x41f   :  { %v3069_v35 = vmul.f32 0.25, %v1765_v1  ;;  %vm1389_vm7 = vcmp.eq.s32.totalorder %v1357_v44, %v2941_v9  ;;  %v1258_v54 = vshra.s32 %v1226_v58, 4  ;;  %v1373_v52 = vshra.s32 %v1307_v41, 1  ;;  %v3100_v44 = vpop.f32.mrf.mxu2 }
 0x420   :  { %1656 = vmatpush.msra.mxu2 %v3065_v46  ;;  %vm1485_vm8 = vmand %vm1389_vm7, %vm1453_vm6  ;;  %v1322_v18 = vand.u32 15, %v1226_v58  ;;  %v1274_v48 = vshra.s32 %v1242_v38, 4  ;;  %v1338_v23 = vand.u32 15, %v1242_v38  ;;  %vm1469_vm9 = vcmp.eq.s32.totalorder %v1437_v60, %v2944_v32  ;;  %v3103_v60 = vpop.f32.mrf.mxu3 }
 0x421   :  { %1676 = vmatpush.msra.mxu3 %v3069_v35  ;;  %v1748_v16 = vsel %vm1485_vm8, 1.0, %v3295_v39  ;;  %v1290_v10 = vand.u32 15, %v1258_v54  ;;  %v1225_v53 = vadd.s32 40, %v2934_v63  ;;  %vm1405_vm10 = vcmp.eq.s32.totalorder %v1373_v52, %v2941_v9 }
 0x422   :  { %v3077_v20 = vmul.f32 0.25, %v1748_v16  ;;  %v1420_v57 = vshra.s32 %v1322_v18, 1  ;;  %v1306_v27 = vand.u32 15, %v1274_v48  ;;  %vm1501_vm11 = vmand %vm1405_vm10, %vm1469_vm9  ;;  %v1436_v40 = vshra.s32 %v1338_v23, 1 }
 0x423   :  { %v1356_v0 = vshra.s32 %v1290_v10, 1  ;;  %v1257_v6 = vshra.s32 %v1225_v53, 4  ;;  %v1321_v42 = vand.u32 15, %v1225_v53  ;;  %v1764_v33 = vsel %vm1501_vm11, 1.0, %v3295_v39 }
 0x424   :  { %1657 = vmatpush.msra.mxu2 %v3077_v20  ;;  %vm1452_vm12 = vcmp.eq.s32.totalorder %v1420_v57, %v2944_v32  ;;  %v1372_v17 = vshra.s32 %v1306_v27, 1  ;;  %v1241_v19 = vadd.s32 168, %v2934_v63  ;;  %v3084_v29 = vmul.f32 0.25, %v1764_v33 }
 0x425   :  { %vm1388_vm13 = vcmp.eq.s32.totalorder %v1356_v0, %v2941_v9  ;;  %vm1468_vm15 = vcmp.eq.s32.totalorder %v1436_v40, %v2944_v32  ;;  %v1289_v34 = vand.u32 15, %v1257_v6  ;;  %v1419_v45 = vshra.s32 %v1321_v42, 1 }
 0x426   :  { %vm1484_vm0 = vmand %vm1388_vm13, %vm1452_vm12  ;;  %vm1404_vm1 = vcmp.eq.s32.totalorder %v1372_v17, %v2941_v9  ;;  %v1273_v24 = vshra.s32 %v1241_v19, 4  ;;  %v1337_v21 = vand.u32 15, %v1241_v19  ;;  %1677 = vmatpush.msra.mxu3 %v3084_v29  ;;  %v1224_v50 = vadd.s32 32, %v2934_v63 }
 0x427   :  { %v1747_v30 = vsel %vm1484_vm0, 1.0, %v3295_v39  ;;  %vm1500_vm2 = vmand %vm1404_vm1, %vm1468_vm15  ;;  %v1355_v59 = vshra.s32 %v1289_v34, 1  ;;  %v1240_v36 = vadd.s32 160, %v2934_v63  ;;  %vm1451_vm3 = vcmp.eq.s32.totalorder %v1419_v45, %v2944_v32 }
 0x428   :  { %v3093_v3 = vmul.f32 0.25, %v1747_v30  ;;  %v1763_v55 = vsel %vm1500_vm2, 1.0, %v3295_v39  ;;  %v1305_v15 = vand.u32 15, %v1273_v24  ;;  %v1435_v12 = vshra.s32 %v1337_v21, 1 }
 0x429   :  { %v3097_v25 = vmul.f32 0.25, %v1763_v55  ;;  %vm1387_vm4 = vcmp.eq.s32.totalorder %v1355_v59, %v2941_v9  ;;  %v1256_v28 = vshra.s32 %v1224_v50, 4  ;;  %v1320_v38 = vand.u32 15, %v1224_v50 }
 0x42a   :  { %1658 = vmatpush.msra.mxu2 %v3093_v3  ;;  %vm1483_vm6 = vmand %vm1387_vm4, %vm1451_vm3  ;;  %v1371_v58 = vshra.s32 %v1305_v15, 1  ;;  %v1272_v1 = vshra.s32 %v1240_v36, 4  ;;  %v1336_v41 = vand.u32 15, %v1240_v36  ;;  %vm1467_vm7 = vcmp.eq.s32.totalorder %v1435_v12, %v2944_v32 }
 0x42b   :  { %1678 = vmatpush.msra.mxu3 %v3097_v25  ;;  %v1746_v52 = vsel %vm1483_vm6, 1.0, %v3295_v39  ;;  %v1288_v18 = vand.u32 15, %v1256_v28  ;;  %v1418_v27 = vshra.s32 %v1320_v38, 1  ;;  %v1223_v6 = vadd.s32 24, %v2934_v63 }
 0x42c   :  { %v3114_v53 = vmul.f32 0.25, %v1746_v52  ;;  %vm1403_vm8 = vcmp.eq.s32.totalorder %v1371_v58, %v2941_v9  ;;  %v1304_v0 = vand.u32 15, %v1272_v1  ;;  %v1434_v40 = vshra.s32 %v1336_v41, 1 }
 0x42d   :  { %vm1499_vm9 = vmand %vm1403_vm8, %vm1467_vm7  ;;  %v1354_v57 = vshra.s32 %v1288_v18, 1  ;;  %vm1450_vm11 = vcmp.eq.s32.totalorder %v1418_v27, %v2944_v32  ;;  %v1255_v17 = vshra.s32 %v1223_v6, 4  ;;  %v1319_v19 = vand.u32 15, %v1223_v6 }
 0x42e   :  { %1659 = vmatpush.msra.mxu2 %v3114_v53  ;;  %v1370_v33 = vshra.s32 %v1304_v0, 1  ;;  %vm1466_vm13 = vcmp.eq.s32.totalorder %v1434_v40, %v2944_v32  ;;  %v1222_v21 = vadd.s32 16, %v2934_v63  ;;  %v1238_v52 = vadd.s32 144, %v2934_v63 }
 0x42f   :  { %vm1386_vm10 = vcmp.eq.s32.totalorder %v1354_v57, %v2941_v9  ;;  %v1287_v59 = vand.u32 15, %v1255_v17  ;;  %v1417_v50 = vshra.s32 %v1319_v19, 1  ;;  %v1221_v0 = vadd.s32 8, %v2934_v63 }
 0x430   :  { %vm1482_vm12 = vmand %vm1386_vm10, %vm1450_vm11  ;;  %v1254_v28 = vshra.s32 %v1222_v21, 4  ;;  %v1318_v58 = vand.u32 15, %v1222_v21  ;;  %v1270_v18 = vshra.s32 %v1238_v52, 4  ;;  %v1237_v40 = vadd.s32 136, %v2934_v63 }
 0x431   :  { %v1745_v45 = vsel %vm1482_vm12, 1.0, %v3295_v39  ;;  %v1353_v1 = vshra.s32 %v1287_v59, 1  ;;  %vm1449_vm0 = vcmp.eq.s32.totalorder %v1417_v50, %v2944_v32  ;;  %v1252_v6 = vshra.s32 %v2934_v63, 4 }
 0x432   :  { %v3131_v30 = vmul.f32 0.25, %v1745_v45  ;;  %v1269_v17 = vshra.s32 %v1237_v40, 4 }
 0x433   :  { %vm1385_vm2 = vcmp.eq.s32.totalorder %v1353_v1, %v2941_v9  ;;  %v1284_v19 = vand.u32 15, %v1252_v6 }
 0x434   :  { %1660 = vmatpush.msra.mxu2 %v3131_v30  ;;  %vm1481_vm4 = vmand %vm1385_vm2, %vm1449_vm0  ;;  %v1301_v21 = vand.u32 15, %v1269_v17 }
 0x453   :  { %v3063_v14 = vpop.permute.xlu2 %1072 }
 0x45b   :  { %v1065_v5 = vpop.permute.xlu2 %1064 }
 0x45c   :  { %v1113_v48 = vsel %vm323_vm5, %v1065_v5, %v2883_v37  ;;  %v1762_v37 = vsel %vm1499_vm9, 1.0, %v3295_v39 }
 0x45d   :  { %v3122_v42 = vmul.f32 0.25, %v1762_v37 }
 0x45f   :  { %1679 = vmatpush.msra.mxu3 %v3122_v42 }
 0x46b   :  { %v1075_v54 = vpop.permute.xlu0 %1074 }
 0x46c   :  { %v1063_v23 = vpop.permute.xlu1 %1062  ;;  %v1116_v16 = vsel %vm323_vm5, %v3063_v14, %v1075_v54  ;;  %v1117_v10 = vsel %vm323_vm5, %v1075_v54, %v2878_v47  ;;  %v1239_v47 = vadd.s32 152, %v2934_v63  ;;  %v1416_v54 = vshra.s32 %v1318_v58, 1 }
 0x46d   :  { %1169 = vmatpush.bf16.msrb.mxu0 %v1116_v16  ;;  %1182 = vmatpush.bf16.msrb.mxu1 %v1117_v10  ;;  %v1112_v14 = vsel %vm323_vm5, %v1063_v23, %v1065_v5  ;;  %vm1402_vm5 = vcmp.eq.s32.totalorder %v1370_v33, %v2941_v9  ;;  %v1302_v16 = vand.u32 15, %v1270_v18  ;;  %v1317_v33 = vand.u32 15, %v1221_v0 }
 0x46e   :  { %v1271_v34 = vshra.s32 %v1239_v47, 4  ;;  %v1335_v24 = vand.u32 15, %v1239_v47  ;;  %vm1498_vm15 = vmand %vm1402_vm5, %vm1466_vm13  ;;  %vm1448_vm6 = vcmp.eq.s32.totalorder %v1416_v54, %v2944_v32  ;;  %v1253_v47 = vshra.s32 %v1221_v0, 4 }
 0x46f   :  { %v1761_v5 = vsel %vm1498_vm15, 1.0, %v3295_v39  ;;  %v1368_v27 = vshra.s32 %v1302_v16, 1 }
 0x470   :  { %v1303_v36 = vand.u32 15, %v1271_v34  ;;  %v1433_v55 = vshra.s32 %v1335_v24, 1  ;;  %v3141_v38 = vmul.f32 0.25, %v1761_v5  ;;  %v1316_v34 = vand.u32 15, %v2934_v63 }
 0x471   :  { %1170 = vmatpush.bf16.msrb.mxu0 %v1112_v14  ;;  %1183 = vmatpush.bf16.msrb.mxu1 %v1113_v48  ;;  %v1334_v48 = vand.u32 15, %v1238_v52  ;;  %vm1400_vm10 = vcmp.eq.s32.totalorder %v1368_v27, %v2941_v9  ;;  %v1285_v45 = vand.u32 15, %v1253_v47  ;;  %v1415_v24 = vshra.s32 %v1317_v33, 1 }
 0x472   :  { %v1369_v41 = vshra.s32 %v1303_v36, 1  ;;  %vm1465_vm1 = vcmp.eq.s32.totalorder %v1433_v55, %v2944_v32  ;;  %1680 = vmatpush.msra.mxu3 %v3141_v38  ;;  %v1350_v36 = vshra.s32 %v1284_v19, 1  ;;  %v1414_v5 = vshra.s32 %v1316_v34, 1 }
 0x473   :  { %v3135_v15 = vpop.f32.mrf.mxu2  ;;  %v3137_v12 = vpop.f32.mrf.mxu3  ;;  %v1351_v55 = vshra.s32 %v1285_v45, 1  ;;  %vm1447_vm12 = vcmp.eq.s32.totalorder %v1415_v24, %v2944_v32 }
 0x474   :  { %1737 = vmatmul.msk.bf16.vlgmr.msrb.gmra.mxu0 %vm684_vm14, %v2891_v62  ;;  %1738 = vmatmul.msk.bf16.vlgmr.msrb.gmra.mxu1 %vm684_vm14, %v2891_v62  ;;  %vm1401_vm3 = vcmp.eq.s32.totalorder %v1369_v41, %v2941_v9  ;;  %v1744_v62 = vsel %vm1481_vm4, 1.0, %v3295_v39  ;;  %v3164_v10 = vpop.permute.xlu0 %564  ;;  %vm1382_vm5 = vcmp.eq.s32.totalorder %v1350_v36, %v2941_v9  ;;  %vm1446_vm15 = vcmp.eq.s32.totalorder %v1414_v5, %v2944_v32 }
 0x475   :  { %1606 = vmatpush.msra.mxu0 %v2965_v2  ;;  %1626 = vmatpush.msra.mxu1 %v2970_v8  ;;  %v1286_v2 = vand.u32 15, %v1254_v28  ;;  %vm1497_vm14 = vmand %vm1401_vm3, %vm1465_vm1  ;;  %vm1383_vm0 = vcmp.eq.s32.totalorder %v1351_v55, %v2941_v9 }
 0x476   :  { %v1760_v23 = vsel %vm1497_vm14, 1.0, %v3295_v39  ;;  %vm1478_vm2 = vmand %vm1382_vm5, %vm1446_vm15 }
 0x477   :  { %1607 = vmatpush.msra.mxu0 %v2978_v49  ;;  %v1352_v8 = vshra.s32 %v1286_v2, 1  ;;  %1627 = vmatpush.msra.mxu1 %v2982_v22  ;;  %v3160_v49 = vmul.f32 0.25, %v1744_v62  ;;  %v3168_v22 = vmul.f32 0.25, %v1760_v23  ;;  %vm1479_vm3 = vmand %vm1383_vm0, %vm1447_vm12 }
 0x478   :  { %v1742_v1 = vsel %vm1479_vm3, 1.0, %v3295_v39 }
 0x479   :  { %1608 = vmatpush.msra.mxu0 %v2994_v13  ;;  %vm1384_vm7 = vcmp.eq.s32.totalorder %v1352_v8, %v2941_v9  ;;  %1628 = vmatpush.msra.mxu1 %v2998_v7  ;;  %v1432_v13 = vshra.s32 %v1334_v48, 1  ;;  %v1575_v41 = vmul.f32 0.25, %v1742_v1 }
 0x47a   :  { %vm1480_vm8 = vmand %vm1384_vm7, %vm1448_vm6  ;;  %1661 = vmatpush.msra.mxu2 %v3160_v49  ;;  %1681 = vmatpush.msra.mxu3 %v3168_v22 }
 0x47b   :  { %1609 = vmatpush.msra.mxu0 %v3005_v31  ;;  %v1743_v57 = vsel %vm1480_vm8, 1.0, %v3295_v39  ;;  %v1200_v37 = vpop.f32.mrf.mxu2  ;;  %v1213_v14 = vpop.f32.mrf.mxu3  ;;  %1629 = vmatpush.msra.mxu1 %v3011_v51  ;;  %vm1464_vm9 = vcmp.eq.s32.totalorder %v1432_v13, %v2944_v32  ;;  %v741_v31 = vadd.f32 %v3100_v44, %v3164_v10  ;;  %v1333_v51 = vand.u32 15, %v1237_v40 }
 0x47c   :  { %v3178_v7 = vmul.f32 0.25, %v1743_v57  ;;  %vm1496_vm11 = vmand %vm1400_vm10, %vm1464_vm9  ;;  %v1236_v44 = vadd.s32 128, %v2934_v63  ;;  %v1367_v63 = vshra.s32 %v1301_v21, 1  ;;  %vm1647_vm8 = vcmask 523264  }
 0x47d   :  { %1610 = vmatpush.msra.mxu0 %v3019_v43  ;;  %1630 = vmatpush.msra.mxu1 %v3026_v4  ;;  %v1759_v43 = vsel %vm1496_vm11, 1.0, %v3295_v39  ;;  %v3193_v4 = vpop.permute.xlu1 %1034  ;;  %v1431_v50 = vshra.s32 %v1333_v51, 1  ;;  %vm1694_vm9 = vcmask 1048064  }
 0x47e   :  { %1662 = vmatpush.msra.mxu2 %v3178_v7  ;;  %v1592_v59 = vmul.f32 0.25, %v1759_v43  ;;  %vm1399_vm1 = vcmp.eq.s32.totalorder %v1367_v63, %v2941_v9 }
 0x47f   :  { %1611 = vmatpush.msra.mxu0 %v3035_v26  ;;  %1631 = vmatpush.msra.mxu1 %v3039_v61  ;;  %v1268_v26 = vshra.s32 %v1236_v44, 4  ;;  %vm1463_vm13 = vcmp.eq.s32.totalorder %v1431_v50, %v2944_v32  ;;  %v1332_v61 = vand.u32 15, %v1236_v44 }
 0x480   :  { %1682 = vmatpush.msra.mxu3 %v1592_v59  ;;  %vm1495_vm4 = vmand %vm1399_vm1, %vm1463_vm13  ;;  %1663 = vmatpush.msra.mxu2 %v1575_v41 }
 0x481   :  { %1612 = vmatpush.msra.mxu0 %v3047_v11  ;;  %1632 = vmatpush.msra.mxu1 %v3054_v56  ;;  %v1199_v11 = vadd.f32 %v3135_v15, %v3193_v4  ;;  %v1300_v28 = vand.u32 15, %v1268_v26  ;;  %v1741_v56 = vsel %vm1478_vm2, 1.0, %v3295_v39  ;;  %v1430_v58 = vshra.s32 %v1332_v61, 1 }
 0x482   :  { %v1212_v15 = vadd.f32 %v3137_v12, %v3193_v4  ;;  %v1758_v2 = vsel %vm1495_vm4, 1.0, %v3295_v39  ;;  %v1574_v54 = vmul.f32 0.25, %v1741_v56 }
 0x483   :  { %1613 = vmatpush.msra.mxu0 %v3065_v46  ;;  %1633 = vmatpush.msra.mxu1 %v3069_v35  ;;  %v755_v46 = vadd.f32 %v3103_v60, %v3164_v10  ;;  %v1366_v35 = vshra.s32 %v1300_v28, 1  ;;  %vm1462_vm6 = vcmp.eq.s32.totalorder %v1430_v58, %v2944_v32  ;;  %v1591_v60 = vmul.f32 0.25, %v1758_v2 }
 0x484   :  { %1664 = vmatpush.msra.mxu2 %v1574_v54 }
 0x485   :  { %1614 = vmatpush.msra.mxu0 %v3077_v20  ;;  %1634 = vmatpush.msra.mxu1 %v3084_v29  ;;  %v1217_v20 = vadd.f32 %v1199_v11, %v741_v31  ;;  %vm1398_vm14 = vcmp.eq.s32.totalorder %v1366_v35, %v2941_v9  ;;  %v1218_v12 = vadd.f32 %v1212_v15, %v755_v46  ;;  %v712_v9 = vpop.f32.mrf.mxu0 }
 0x486   :  { %vm1494_vm7 = vmand %vm1398_vm14, %vm1462_vm6  ;;  %1683 = vmatpush.msra.mxu3 %v1591_v60 }
 0x487   :  { %1615 = vmatpush.msra.mxu0 %v3093_v3  ;;  %1635 = vmatpush.msra.mxu1 %v3097_v25  ;;  %v1757_v29 = vsel %vm1494_vm7, 1.0, %v3295_v39  ;;  %v726_v39 = vpop.f32.mrf.mxu1  ;;  %v713_v25 = vadd.f32 %v712_v9, %v3164_v10 }
 0x488   :  { %v1590_v32 = vmul.f32 0.25, %v1757_v29  ;;  %1665 = vmatmul.f32.vlgmr.msra.gmra.mxu2 %v1217_v20 }
 0x489   :  { %1616 = vmatpush.msra.mxu0 %v3114_v53  ;;  %1636 = vmatpush.msra.mxu1 %v3122_v42 }
 0x48a   :  { %1684 = vmatpush.msra.mxu3 %v1590_v32 }
 0x48b   :  { %1617 = vmatpush.msra.mxu0 %v3131_v30  ;;  %1637 = vmatpush.msra.mxu1 %v3141_v38  ;;  %v727_v30 = vadd.f32 %v726_v39, %v3164_v10 }
 0x48c   :  { %1685 = vmatmul.f32.vlgmr.msra.gmra.mxu3 %v1218_v12 }
 0x48d   :  { %1618 = vmatpush.msra.mxu0 %v3160_v49  ;;  %1638 = vmatpush.msra.mxu1 %v3168_v22 }
 0x48f   :  { %1619 = vmatpush.msra.mxu0 %v3178_v7  ;;  %1639 = vmatpush.msra.mxu1 %v1592_v59 }
 0x491   :  { %1620 = vmatpush.msra.mxu0 %v1575_v41  ;;  %1640 = vmatpush.msra.mxu1 %v1591_v60 }
 0x493   :  { %1621 = vmatpush.msra.mxu0 %v1574_v54  ;;  %1641 = vmatpush.msra.mxu1 %v1590_v32 }
 0x4f1   :  { %v1172_v3 = vpop.f32.mrf.mxu0  ;;  %v1185_v42 = vpop.f32.mrf.mxu1 }
 0x4f2   :  { %v1173_v53 = vadd.f32 %v1172_v3, %v3193_v4  ;;  %v1186_v38 = vadd.f32 %v1185_v42, %v3193_v4 }
 0x4f4   :  { %v1215_v52 = vadd.f32 %v1173_v53, %v713_v25  ;;  %v1216_v8 = vadd.f32 %v1186_v38, %v727_v30 }
 0x4f6   :  { %1622 = vmatmul.f32.vlgmr.msra.gmra.mxu0 %v1215_v52  ;;  %1642 = vmatmul.f32.vlgmr.msra.gmra.mxu1 %v1216_v8 }
 0x4f9   :  { %v1174_v18 = vpop.f32.mrf.mxu0  ;;  %v1187_v48 = vpop.f32.mrf.mxu1 }
 0x50b   :  { %v1666_v62 = vpop.f32.mrf.mxu2 }
 0x50f   :  { %v1686_v49 = vpop.f32.mrf.mxu3 }
 0x510   :  { %v1687_v23 = vadd.f32 %v1686_v49, %v1666_v62 }
 0x512   :  { %v1689_v16 = vmax.f32 %v1687_v23, 0.0 }
 0x514   :  { %1691 = vrot.lane.b32.xlu2 %v1689_v16, %s2057_s2 }
 0x56e   :  { %v1692_v27 = vpop.permute.xlu2 %1691 }
 0x573   :  { %v1623_v22 = vpop.f32.mrf.mxu0  ;;  %v1643_v13 = vpop.f32.mrf.mxu1 }
 0x574   :  { %v1644_v57 = vadd.f32 %v1643_v13, %v1623_v22 }
 0x576   :  { %v1646_v10 = vmax.f32 %v1644_v57, 0.0 }
 0x578   :  { %1648 = vst.msk [vmem:[#allocation6] sm:$0xff] %vm1647_vm8, %v1646_v10 }
 0x579   :  { %1695 = vst.msk [vmem:[#allocation6] sm:$0xff] %vm1694_vm9, %v1692_v27 }
 0x57a   :  { %1706 = dma.vmem_to_hbm [thread:$0]  %s1702_s18, 128, %s1704_s21, [#allocation5]  }
 0x57b   :  { %2039 = dma.done.wait [#allocation5], 128  }
 0x57c   :  { %2040 = vsyncadd [#allocation5], 4294967168 }
 0x57d   :  { %1711 = vsyncpa [#allocation4], 1 }
 0x57e   :  { %1712 = vsyncpa [#allocation5], 1 }

</bundles_post_ra>
